<compile_context>
chip_gen: v7x
topology: tpu7x:2x2x1
jax: 0.10.0
libtpu: 0.0.40
codegen_flags: <defaults>
</compile_context>

<pallas_src>
import functools

import jax
import jax.numpy as jnp
from jax import lax
from jax.experimental import pallas as pl
from jax.experimental.pallas import tpu as pltpu


# ----------------------------------------------------------------------------
# Pallas kernel: fused 2-layer bidirectional LSTM -> online pooling -> head
# ----------------------------------------------------------------------------
def _lstm_net_kernel(
    xcat_ref,                                # (T*BT, 2E)  [x(t) | x(T-1-t)] per row
    wih1_ref, b1_ref, whh1_ref,              # layer-1 fused weights
    wih2a_ref, wih2b_ref, b2_ref, whh2_ref,  # layer-2 fused weights
    w12_ref, bl12_ref,                       # fused dense head (BN folded in)
    wo_ref, bo_ref,                          # linear_out
    out_ref,                                 # (BT, 1)
    gx_ref, s1_ref,                          # scratch
    *, T, BT, H):
    f32 = jnp.float32
    H2 = 2 * H
    D = 4 * H

    def fused_bilstm(whh_ref, store, pool):
        """One fused fwd+bwd LSTM pass over precomputed gate projections gx_ref.

        h/c layout: (BT, 2H) = [fwd(s) | bwd(T-1-s)].
        Fused gate column order is [i | f | o | g] (2H lanes each, both
        directions interleaved per gate), so the three sigmoids collapse to a
        single EUP pass over a contiguous 6H slice.
        """
        w_hh = whh_ref[...]                                   # (2H, 8H) block-diag
        h = jnp.zeros((BT, H2), f32)
        c = jnp.zeros((BT, H2), f32)
        ssum = jnp.zeros((BT, H2), f32)
        smax = jnp.full((BT, H2), -jnp.inf, f32)
        # T is a small static int -> full unroll with static, 8-aligned offsets.
        # TODO(synk): switch to lax.fori_loop(..., unroll=True) if T grows past ~16.
        # TODO(synk): keep w_hh resident in MXU weight regs across the unrolled
        #             steps via pltpu.matmul_push_rhs / matmul_acc_lhs / matmul_pop.
        for s in range(T):
            gates = (jnp.dot(h, w_hh, preferred_element_type=f32)
                     + gx_ref[pl.ds(s * BT, BT), :])          # (BT, 8H); 8H = 128 lanes
            ifo = jax.nn.sigmoid(gates[:, 0:3 * H2])          # one sigmoid, 6H lanes
            g_g = jnp.tanh(gates[:, 3 * H2:4 * H2])
            i_g = ifo[:, 0:H2]
            f_g = ifo[:, H2:2 * H2]
            o_g = ifo[:, 2 * H2:3 * H2]
            c = f_g * c + i_g * g_g
            h = o_g * jnp.tanh(c)                             # (BT, 2H)
            if store:
                s1_ref[pl.ds(s * BT, BT), :] = h
            if pool:
                ssum = ssum + h
                smax = jnp.maximum(smax, h)
        return ssum, smax

    # ----- layer 1: hoisted input projection (single MXU matmul) + recurrence -----
    gx_ref[...] = (jnp.dot(xcat_ref[...], wih1_ref[...], preferred_element_type=f32)
                   + b1_ref[...])
    fused_bilstm(whh1_ref, store=True, pool=False)

    # ----- layer 2: hoisted projections from layer-1 outputs + recurrence + pooling -----
    # s1 rows at fused step s are [h1_f(s) | h1_b(T-1-s)]; the second operand the
    # fused step needs is exactly s1 at step (T-1-s), so the time reversal is done
    # once on the projected result (static 8-aligned slices, off the serial path).
    s1 = s1_ref[...]
    gxa = jnp.dot(s1, wih2a_ref[...], preferred_element_type=f32) + b2_ref[...]
    gxb = jnp.dot(s1, wih2b_ref[...], preferred_element_type=f32)
    for s in range(T):
        gx_ref[pl.ds(s * BT, BT), :] = (gxa[s * BT:(s + 1) * BT, :]
                                        + gxb[(T - 1 - s) * BT:(T - s) * BT, :])
    ssum, smax = fused_bilstm(whh2_ref, store=False, pool=True)

    avg_pool = ssum * (1.0 / T)
    h_conc = jnp.concatenate([smax, avg_pool], axis=1)        # (BT, 4H)

    # ----- fused dense head: one lane-dense N=2D=128 matmul; BN folded in -----
    h12 = jnp.maximum(jnp.dot(h_conc, w12_ref[...], preferred_element_type=f32)
                      + bl12_ref[...], 0.0)                   # (BT, 2D) = [relu1 | relu2]
    hidden = h_conc + h12[:, 0:D] + h12[:, D:2 * D]           # dropout = identity (eval)
    out_ref[...] = jnp.dot(hidden, wo_ref[...], preferred_element_type=f32) + bo_ref[...]


# ----------------------------------------------------------------------------
# Wrapper: weight packing / BN folding / embedding gather (glue), kernel call
# ----------------------------------------------------------------------------
_FUSED_GATE_SRC = (0, 1, 3, 2)   # fused order [i|f|o|g] drawn from source order [i|f|g|o]


def _gate_cols(w, direction, H):
    """Scatter a (in, 4H) i|f|g|o weight block into the fused (in, 8H) layout.

    Fused gate g (order i, f, o, g) of direction d (0=fwd, 1=bwd) occupies
    columns [(2g+d)H, (2g+d+1)H), so the sigmoid gates form one contiguous 6H
    slice and tanh(g) the trailing 2H slice.
    """
    n_in = w.shape[0]
    out = jnp.zeros((n_in, 8 * H), w.dtype)
    for g, src in enumerate(_FUSED_GATE_SRC):
        out = out.at[:, (2 * g + direction) * H:(2 * g + direction + 1) * H].set(
            w[:, src * H:(src + 1) * H])
    return out


def neural_net_forward(x_tokens, p, lstm_units, *, batch_tile=8):
    H = lstm_units
    D = 4 * H
    BT = batch_tile
    assert BT % 8 == 0, "batch tile must be a sublane multiple of 8"

    emb = jnp.take(p["embedding"], x_tokens, axis=0)            # (B, T, E)
    B, T, E = emb.shape
    Bp = ((B + BT - 1) // BT) * BT                              # pad batch (pad rows sliced off)
    n_bt = Bp // BT

    x_tm = jnp.transpose(emb, (1, 0, 2)).astype(jnp.float32)    # (T, B, E)
    if Bp != B:
        x_tm = jnp.pad(x_tm, ((0, 0), (0, Bp - B), (0, 0)))     # zero pad rows
    # forward + time-reversed copies lane-concatenated; time-major rows per batch tile:
    xcat = jnp.concatenate([x_tm, x_tm[::-1]], axis=-1)         # (T, Bp, 2E)
    xcat = (xcat.reshape(T, n_bt, BT, 2 * E)
                 .transpose(1, 0, 2, 3)
                 .reshape(n_bt, T * BT, 2 * E))

    # ---- layer-1 fused weights ----
    wih1 = jnp.concatenate([_gate_cols(p["wih1f"], 0, H),
                            _gate_cols(p["wih1b"], 1, H)], axis=0)      # (2E, 8H)
    b1 = _gate_cols(p["b1f"], 0, H) + _gate_cols(p["b1b"], 1, H)        # (1, 8H)
    whh1 = jnp.concatenate([_gate_cols(p["whh1f"], 0, H),
                            _gate_cols(p["whh1b"], 1, H)], axis=0)      # (2H, 8H)

    # ---- layer-2 fused weights ----
    # s1 rows = [h1_f(s) | h1_b(T-1-s)]; s1 at step T-1-s supplies the rest.
    wih2a = jnp.concatenate([_gate_cols(p["wih2f"][:H], 0, H),
                             _gate_cols(p["wih2b"][H:], 1, H)], axis=0)  # (2H, 8H)
    wih2b = jnp.concatenate([_gate_cols(p["wih2b"][:H], 1, H),
                             _gate_cols(p["wih2f"][H:], 0, H)], axis=0)  # (2H, 8H)
    b2 = _gate_cols(p["b2f"], 0, H) + _gate_cols(p["b2b"], 1, H)
    whh2 = jnp.concatenate([_gate_cols(p["whh2f"], 0, H),
                            _gate_cols(p["whh2b"], 1, H)], axis=0)

    # ---- fold eval-mode BatchNorm affine into linear1/linear2, fuse the two heads ----
    scale = p["gamma"] * lax.rsqrt(p["rvar"] + 1e-5)            # (1, D)
    shift = p["beta"] - p["rmean"] * scale                      # (1, D)
    w12 = jnp.concatenate([p["w1"] * scale, p["w2"] * scale], axis=1)                    # (D, 2D)
    bl12 = jnp.concatenate([p["bl1"] * scale + shift, p["bl2"] * scale + shift], axis=1)  # (1, 2D)

    args = [xcat, wih1, b1, whh1, wih2a, wih2b, b2, whh2, w12, bl12, p["wo"], p["bo"]]

    def full_spec(a):
        nd = a.ndim
        return pl.BlockSpec(a.shape, lambda b: (0,) * nd)       # weights: fetched once, resident

    in_specs = ([pl.BlockSpec((None, T * BT, 2 * E), lambda b: (b, 0, 0))]
                + [full_spec(a) for a in args[1:]])
    out_specs = pl.BlockSpec((None, BT, 1), lambda b: (b, 0, 0))

    kernel = functools.partial(_lstm_net_kernel, T=T, BT=BT, H=H)
    out = pl.pallas_call(
        kernel,
        grid=(n_bt,),
        out_shape=jax.ShapeDtypeStruct((n_bt, BT, 1), jnp.float32),
        in_specs=in_specs,
        out_specs=out_specs,
        scratch_shapes=[
            pltpu.VMEM((T * BT, 8 * H), jnp.float32),   # gx: hoisted gate projections (both layers)
            pltpu.VMEM((T * BT, 2 * H), jnp.float32),   # layer-1 outputs, step-indexed
        ],
        compiler_params=pltpu.CompilerParams(
            dimension_semantics=("parallel",),          # batch tiles -> v7x 2nd TensorCore
        ),
    )(*args)
    return out.reshape(Bp, 1)[:B]


# ----------------------------------------------------------------------------
# Pure-JAX reference (same math) for a correctness check
# ----------------------------------------------------------------------------
def reference_forward(x_tokens, p, lstm_units):
    H = lstm_units
    emb = jnp.take(p["embedding"], x_tokens, axis=0)            # (B, T, E)
    xs = jnp.transpose(emb, (1, 0, 2)).astype(jnp.float32)      # (T, B, E)
    B = xs.shape[1]

    def lstm_dir(xs, w_ih, w_hh, b, reverse):
        def step(carry, x_t):
            h, c = carry
            gates = x_t @ w_ih + h @ w_hh + b
            i = jax.nn.sigmoid(gates[:, 0:H])
            f = jax.nn.sigmoid(gates[:, H:2 * H])
            g = jnp.tanh(gates[:, 2 * H:3 * H])
            o = jax.nn.sigmoid(gates[:, 3 * H:4 * H])
            c = f * c + i * g
            h = o * jnp.tanh(c)
            return (h, c), h

        seq = xs[::-1] if reverse else xs
        (_, _), hs = lax.scan(step, (jnp.zeros((B, H)), jnp.zeros((B, H))), seq)
        return hs[::-1] if reverse else hs

    h1 = jnp.concatenate(
        [lstm_dir(xs, p["wih1f"], p["whh1f"], p["b1f"], False),
         lstm_dir(xs, p["wih1b"], p["whh1b"], p["b1b"], True)], axis=-1)
    h2 = jnp.concatenate(
        [lstm_dir(h1, p["wih2f"], p["whh2f"], p["b2f"], False),
         lstm_dir(h1, p["wih2b"], p["whh2b"], p["b2b"], True)], axis=-1)

    avg_pool = jnp.mean(h2, axis=0)
    max_pool = jnp.max(h2, axis=0)
    h_conc = jnp.concatenate([max_pool, avg_pool], axis=1)

    def bn(z):
        return (z - p["rmean"]) * lax.rsqrt(p["rvar"] + 1e-5) * p["gamma"] + p["beta"]

    l1 = jnp.maximum(bn(h_conc @ p["w1"] + p["bl1"]), 0.0)
    l2 = jnp.maximum(bn(h_conc @ p["w2"] + p["bl2"]), 0.0)
    hidden = h_conc + l1 + l2
    return hidden @ p["wo"] + p["bo"]


# ----------------------------------------------------------------------------
# Deterministic parameter init (synthetic weights; no checkpoint load)
# ----------------------------------------------------------------------------
def init_params(key, vocab, E, H):
    D = 4 * H  # dense_hidden_units must equal 4 * lstm_units for this model
    ks = jax.random.split(key, 24)

    def nrm(k, shape, scale=0.1):
        return scale * jax.random.normal(k, shape, dtype=jnp.float32)

    p = {}
    p["embedding"] = nrm(ks[0], (vocab, E), 0.5)
    p["wih1f"], p["whh1f"], p["b1f"] = nrm(ks[1], (E, 4 * H)), nrm(ks[2], (H, 4 * H)), nrm(ks[3], (1, 4 * H))
    p["wih1b"], p["whh1b"], p["b1b"] = nrm(ks[4], (E, 4 * H)), nrm(ks[5], (H, 4 * H)), nrm(ks[6], (1, 4 * H))
    p["wih2f"], p["whh2f"], p["b2f"] = nrm(ks[7], (2 * H, 4 * H)), nrm(ks[8], (H, 4 * H)), nrm(ks[9], (1, 4 * H))
    p["wih2b"], p["whh2b"], p["b2b"] = nrm(ks[10], (2 * H, 4 * H)), nrm(ks[11], (H, 4 * H)), nrm(ks[12], (1, 4 * H))
    p["w1"], p["bl1"] = nrm(ks[13], (D, D)), nrm(ks[14], (1, D))
    p["w2"], p["bl2"] = nrm(ks[15], (D, D)), nrm(ks[16], (1, D))
    p["gamma"] = 1.0 + nrm(ks[17], (1, D))
    p["beta"] = nrm(ks[18], (1, D))
    p["rmean"] = nrm(ks[19], (1, D))
    p["rvar"] = 0.5 + jnp.abs(nrm(ks[20], (1, D)))
    p["wo"], p["bo"] = nrm(ks[21], (D, 1)), nrm(ks[22], (1, 1))
    return p


if __name__ == "__main__":
    # Small, module-consistent shapes:
    #   batch B=2, seq T=8, embed E=32, lstm_units H=16, dense_hidden_units D=64
    vocab, E, H = 50, 32, 16
    B, T = 2, 8

    key = jax.random.PRNGKey(0)
    kp, kx = jax.random.split(key)
    params = init_params(kp, vocab, E, H)
    x_tokens = jax.random.randint(kx, (B, T), 0, vocab, dtype=jnp.int32)

    out = neural_net_forward(x_tokens, params, lstm_units=H)
    out = jax.block_until_ready(out)

    ref = reference_forward(x_tokens, params, lstm_units=H)
    assert out.shape == (B, 1)
    assert bool(jnp.all(jnp.isfinite(out)))
    assert bool(jnp.allclose(out, ref, atol=1e-3, rtol=1e-3))
    # TODO(synk): training-mode SpatialDropout / Dropout (stochastic masks) not
    # implemented; kernel reproduces eval/inference semantics (dropout=identity).
    print("KERNEL_OK")
</pallas_src>

<mosaic_0001>
module attributes {stable_mosaic.version = 11 : i64} {
  func.func @_lstm_net_kernel(%arg0: i32, %arg1: memref<1x64x64xf32, #tpu.memory_space<vmem>>, %arg2: memref<64x128xf32, #tpu.memory_space<vmem>>, %arg3: memref<1x128xf32, #tpu.memory_space<vmem>>, %arg4: memref<32x128xf32, #tpu.memory_space<vmem>>, %arg5: memref<32x128xf32, #tpu.memory_space<vmem>>, %arg6: memref<32x128xf32, #tpu.memory_space<vmem>>, %arg7: memref<1x128xf32, #tpu.memory_space<vmem>>, %arg8: memref<32x128xf32, #tpu.memory_space<vmem>>, %arg9: memref<64x128xf32, #tpu.memory_space<vmem>>, %arg10: memref<1x128xf32, #tpu.memory_space<vmem>>, %arg11: memref<64x1xf32, #tpu.memory_space<vmem>>, %arg12: memref<1x1xf32, #tpu.memory_space<vmem>>, %arg13: memref<1x8x1xf32, #tpu.memory_space<vmem>>, %arg14: memref<64x128xf32, #tpu.memory_space<vmem>>, %arg15: memref<64x32xf32, #tpu.memory_space<vmem>>) attributes {dimension_semantics = [#tpu.dimension_semantics<parallel>], iteration_bounds = array<i64: 1>, scalar_prefetch = 0 : i64, scratch_operands = 2 : i64, tpu.core_type = #tpu.core_type<tc>, window_params = [{transform_indices = @transform_0, window_bounds = array<i64: 1, 64, 64>}, {pipeline_mode = #tpu.pipeline_mode<synchronous>, transform_indices = @transform_1, window_bounds = array<i64: 64, 128>}, {pipeline_mode = #tpu.pipeline_mode<synchronous>, transform_indices = @transform_2, window_bounds = array<i64: 1, 128>}, {pipeline_mode = #tpu.pipeline_mode<synchronous>, transform_indices = @transform_3, window_bounds = array<i64: 32, 128>}, {pipeline_mode = #tpu.pipeline_mode<synchronous>, transform_indices = @transform_4, window_bounds = array<i64: 32, 128>}, {pipeline_mode = #tpu.pipeline_mode<synchronous>, transform_indices = @transform_5, window_bounds = array<i64: 32, 128>}, {pipeline_mode = #tpu.pipeline_mode<synchronous>, transform_indices = @transform_6, window_bounds = array<i64: 1, 128>}, {pipeline_mode = #tpu.pipeline_mode<synchronous>, transform_indices = @transform_7, window_bounds = array<i64: 32, 128>}, {pipeline_mode = #tpu.pipeline_mode<synchronous>, transform_indices = @transform_8, window_bounds = array<i64: 64, 128>}, {pipeline_mode = #tpu.pipeline_mode<synchronous>, transform_indices = @transform_9, window_bounds = array<i64: 1, 128>}, {pipeline_mode = #tpu.pipeline_mode<synchronous>, transform_indices = @transform_10, window_bounds = array<i64: 64, 1>}, {pipeline_mode = #tpu.pipeline_mode<synchronous>, transform_indices = @transform_11, window_bounds = array<i64: 1, 1>}, {transform_indices = @transform_12, window_bounds = array<i64: 1, 8, 1>}]} {
    %c0 = arith.constant 0 : index
    %c0_0 = arith.constant 0 : index
    %c0_1 = arith.constant 0 : index
    %0 = vector.load %arg1[%c0, %c0_0, %c0_1] : memref<1x64x64xf32, #tpu.memory_space<vmem>>, vector<1x64x64xf32>
    %1 = vector.shape_cast %0 : vector<1x64x64xf32> to vector<64x64xf32>
    %c0_2 = arith.constant 0 : index
    %c0_3 = arith.constant 0 : index
    %2 = vector.load %arg2[%c0_2, %c0_3] : memref<64x128xf32, #tpu.memory_space<vmem>>, vector<64x128xf32>
    %cst = arith.constant dense<0.000000e+00> : vector<64x128xf32>
    %3 = tpu.matmul %1, %2, %cst {dimension_numbers = #tpu.dot_dimension_numbers<[1], [0], [0], [1], [0, 0, 1, 1], [], []>} : vector<64x64xf32>, vector<64x128xf32>, vector<64x128xf32> -> vector<64x128xf32>
    %c0_4 = arith.constant 0 : index
    %c0_5 = arith.constant 0 : index
    %4 = vector.load %arg3[%c0_4, %c0_5] : memref<1x128xf32, #tpu.memory_space<vmem>>, vector<1x128xf32>
    %5 = vector.broadcast %4 : vector<1x128xf32> to vector<64x128xf32>
    %6 = arith.addf %3, %5 : vector<64x128xf32>
    %c0_6 = arith.constant 0 : index
    %c0_7 = arith.constant 0 : index
    %7 = vector.load %arg14[%c0_6, %c0_7] : memref<64x128xf32, #tpu.memory_space<vmem>>, vector<64x128xf32>
    tpu.vector_store %arg14[%c0_6, %c0_7], %6 {strides = array<i32>} : memref<64x128xf32, #tpu.memory_space<vmem>>, vector<64x128xf32>,
    %c0_8 = arith.constant 0 : index
    %c0_9 = arith.constant 0 : index
    %8 = vector.load %arg4[%c0_8, %c0_9] : memref<32x128xf32, #tpu.memory_space<vmem>>, vector<32x128xf32>
    %cst_10 = arith.constant 0.000000e+00 : f32
    %9 = vector.broadcast %cst_10 : f32 to vector<8x32xf32>
    %cst_11 = arith.constant 0.000000e+00 : f32
    %10 = vector.broadcast %cst_11 : f32 to vector<8x32xf32>
    %cst_12 = arith.constant dense<0.000000e+00> : vector<8x128xf32>
    %11 = tpu.matmul %9, %8, %cst_12 {dimension_numbers = #tpu.dot_dimension_numbers<[1], [0], [0], [1], [0, 0, 1, 1], [], []>} : vector<8x32xf32>, vector<32x128xf32>, vector<8x128xf32> -> vector<8x128xf32>
    %c0_13 = arith.constant 0 : index
    %c0_14 = arith.constant 0 : index
    %12 = vector.load %arg14[%c0_13, %c0_14] : memref<64x128xf32, #tpu.memory_space<vmem>>, vector<8x128xf32>
    %13 = arith.addf %11, %12 : vector<8x128xf32>
    %14 = vector.extract_strided_slice %13 {offsets = [0, 0], sizes = [8, 96], strides = [1, 1]} : vector<8x128xf32> to vector<8x96xf32>
    %15 = arith.negf %14 : vector<8x96xf32>
    %16 = math.exp %15 : vector<8x96xf32>
    %cst_15 = arith.constant 1.000000e+00 : f32
    %17 = vector.broadcast %cst_15 : f32 to vector<8x96xf32>
    %18 = arith.addf %17, %16 : vector<8x96xf32>
    %19 = arith.divf %17, %18 : vector<8x96xf32>
    %20 = vector.extract_strided_slice %13 {offsets = [0, 96], sizes = [8, 32], strides = [1, 1]} : vector<8x128xf32> to vector<8x32xf32>
    %21 = math.tanh %20 : vector<8x32xf32>
    %22 = vector.extract_strided_slice %19 {offsets = [0, 0], sizes = [8, 32], strides = [1, 1]} : vector<8x96xf32> to vector<8x32xf32>
    %23 = vector.extract_strided_slice %19 {offsets = [0, 32], sizes = [8, 32], strides = [1, 1]} : vector<8x96xf32> to vector<8x32xf32>
    %24 = vector.extract_strided_slice %19 {offsets = [0, 64], sizes = [8, 32], strides = [1, 1]} : vector<8x96xf32> to vector<8x32xf32>
    %25 = arith.mulf %23, %10 : vector<8x32xf32>
    %26 = arith.mulf %22, %21 : vector<8x32xf32>
    %27 = arith.addf %25, %26 : vector<8x32xf32>
    %28 = math.tanh %27 : vector<8x32xf32>
    %29 = arith.mulf %24, %28 : vector<8x32xf32>
    %c0_16 = arith.constant 0 : index
    %c0_17 = arith.constant 0 : index
    %30 = vector.load %arg15[%c0_16, %c0_17] : memref<64x32xf32, #tpu.memory_space<vmem>>, vector<8x32xf32>
    tpu.vector_store %arg15[%c0_16, %c0_17], %29 {strides = array<i32>} : memref<64x32xf32, #tpu.memory_space<vmem>>, vector<8x32xf32>,
    %cst_18 = arith.constant dense<0.000000e+00> : vector<8x128xf32>
    %31 = tpu.matmul %29, %8, %cst_18 {dimension_numbers = #tpu.dot_dimension_numbers<[1], [0], [0], [1], [0, 0, 1, 1], [], []>} : vector<8x32xf32>, vector<32x128xf32>, vector<8x128xf32> -> vector<8x128xf32>
    %c8 = arith.constant 8 : index
    %c0_19 = arith.constant 0 : index
    %32 = vector.load %arg14[%c8, %c0_19] : memref<64x128xf32, #tpu.memory_space<vmem>>, vector<8x128xf32>
    %33 = arith.addf %31, %32 : vector<8x128xf32>
    %34 = vector.extract_strided_slice %33 {offsets = [0, 0], sizes = [8, 96], strides = [1, 1]} : vector<8x128xf32> to vector<8x96xf32>
    %35 = arith.negf %34 : vector<8x96xf32>
    %36 = math.exp %35 : vector<8x96xf32>
    %cst_20 = arith.constant 1.000000e+00 : f32
    %37 = vector.broadcast %cst_20 : f32 to vector<8x96xf32>
    %38 = arith.addf %37, %36 : vector<8x96xf32>
    %39 = arith.divf %37, %38 : vector<8x96xf32>
    %40 = vector.extract_strided_slice %33 {offsets = [0, 96], sizes = [8, 32], strides = [1, 1]} : vector<8x128xf32> to vector<8x32xf32>
    %41 = math.tanh %40 : vector<8x32xf32>
    %42 = vector.extract_strided_slice %39 {offsets = [0, 0], sizes = [8, 32], strides = [1, 1]} : vector<8x96xf32> to vector<8x32xf32>
    %43 = vector.extract_strided_slice %39 {offsets = [0, 32], sizes = [8, 32], strides = [1, 1]} : vector<8x96xf32> to vector<8x32xf32>
    %44 = vector.extract_strided_slice %39 {offsets = [0, 64], sizes = [8, 32], strides = [1, 1]} : vector<8x96xf32> to vector<8x32xf32>
    %45 = arith.mulf %43, %27 : vector<8x32xf32>
    %46 = arith.mulf %42, %41 : vector<8x32xf32>
    %47 = arith.addf %45, %46 : vector<8x32xf32>
    %48 = math.tanh %47 : vector<8x32xf32>
    %49 = arith.mulf %44, %48 : vector<8x32xf32>
    %c8_21 = arith.constant 8 : index
    %c0_22 = arith.constant 0 : index
    %50 = vector.load %arg15[%c8_21, %c0_22] : memref<64x32xf32, #tpu.memory_space<vmem>>, vector<8x32xf32>
    tpu.vector_store %arg15[%c8_21, %c0_22], %49 {strides = array<i32>} : memref<64x32xf32, #tpu.memory_space<vmem>>, vector<8x32xf32>,
    %cst_23 = arith.constant dense<0.000000e+00> : vector<8x128xf32>
    %51 = tpu.matmul %49, %8, %cst_23 {dimension_numbers = #tpu.dot_dimension_numbers<[1], [0], [0], [1], [0, 0, 1, 1], [], []>} : vector<8x32xf32>, vector<32x128xf32>, vector<8x128xf32> -> vector<8x128xf32>
    %c16 = arith.constant 16 : index
    %c0_24 = arith.constant 0 : index
    %52 = vector.load %arg14[%c16, %c0_24] : memref<64x128xf32, #tpu.memory_space<vmem>>, vector<8x128xf32>
    %53 = arith.addf %51, %52 : vector<8x128xf32>
    %54 = vector.extract_strided_slice %53 {offsets = [0, 0], sizes = [8, 96], strides = [1, 1]} : vector<8x128xf32> to vector<8x96xf32>
    %55 = arith.negf %54 : vector<8x96xf32>
    %56 = math.exp %55 : vector<8x96xf32>
    %cst_25 = arith.constant 1.000000e+00 : f32
    %57 = vector.broadcast %cst_25 : f32 to vector<8x96xf32>
    %58 = arith.addf %57, %56 : vector<8x96xf32>
    %59 = arith.divf %57, %58 : vector<8x96xf32>
    %60 = vector.extract_strided_slice %53 {offsets = [0, 96], sizes = [8, 32], strides = [1, 1]} : vector<8x128xf32> to vector<8x32xf32>
    %61 = math.tanh %60 : vector<8x32xf32>
    %62 = vector.extract_strided_slice %59 {offsets = [0, 0], sizes = [8, 32], strides = [1, 1]} : vector<8x96xf32> to vector<8x32xf32>
    %63 = vector.extract_strided_slice %59 {offsets = [0, 32], sizes = [8, 32], strides = [1, 1]} : vector<8x96xf32> to vector<8x32xf32>
    %64 = vector.extract_strided_slice %59 {offsets = [0, 64], sizes = [8, 32], strides = [1, 1]} : vector<8x96xf32> to vector<8x32xf32>
    %65 = arith.mulf %63, %47 : vector<8x32xf32>
    %66 = arith.mulf %62, %61 : vector<8x32xf32>
    %67 = arith.addf %65, %66 : vector<8x32xf32>
    %68 = math.tanh %67 : vector<8x32xf32>
    %69 = arith.mulf %64, %68 : vector<8x32xf32>
    %c16_26 = arith.constant 16 : index
    %c0_27 = arith.constant 0 : index
    %70 = vector.load %arg15[%c16_26, %c0_27] : memref<64x32xf32, #tpu.memory_space<vmem>>, vector<8x32xf32>
    tpu.vector_store %arg15[%c16_26, %c0_27], %69 {strides = array<i32>} : memref<64x32xf32, #tpu.memory_space<vmem>>, vector<8x32xf32>,
    %cst_28 = arith.constant dense<0.000000e+00> : vector<8x128xf32>
    %71 = tpu.matmul %69, %8, %cst_28 {dimension_numbers = #tpu.dot_dimension_numbers<[1], [0], [0], [1], [0, 0, 1, 1], [], []>} : vector<8x32xf32>, vector<32x128xf32>, vector<8x128xf32> -> vector<8x128xf32>
    %c24 = arith.constant 24 : index
    %c0_29 = arith.constant 0 : index
    %72 = vector.load %arg14[%c24, %c0_29] : memref<64x128xf32, #tpu.memory_space<vmem>>, vector<8x128xf32>
    %73 = arith.addf %71, %72 : vector<8x128xf32>
    %74 = vector.extract_strided_slice %73 {offsets = [0, 0], sizes = [8, 96], strides = [1, 1]} : vector<8x128xf32> to vector<8x96xf32>
    %75 = arith.negf %74 : vector<8x96xf32>
    %76 = math.exp %75 : vector<8x96xf32>
    %cst_30 = arith.constant 1.000000e+00 : f32
    %77 = vector.broadcast %cst_30 : f32 to vector<8x96xf32>
    %78 = arith.addf %77, %76 : vector<8x96xf32>
    %79 = arith.divf %77, %78 : vector<8x96xf32>
    %80 = vector.extract_strided_slice %73 {offsets = [0, 96], sizes = [8, 32], strides = [1, 1]} : vector<8x128xf32> to vector<8x32xf32>
    %81 = math.tanh %80 : vector<8x32xf32>
    %82 = vector.extract_strided_slice %79 {offsets = [0, 0], sizes = [8, 32], strides = [1, 1]} : vector<8x96xf32> to vector<8x32xf32>
    %83 = vector.extract_strided_slice %79 {offsets = [0, 32], sizes = [8, 32], strides = [1, 1]} : vector<8x96xf32> to vector<8x32xf32>
    %84 = vector.extract_strided_slice %79 {offsets = [0, 64], sizes = [8, 32], strides = [1, 1]} : vector<8x96xf32> to vector<8x32xf32>
    %85 = arith.mulf %83, %67 : vector<8x32xf32>
    %86 = arith.mulf %82, %81 : vector<8x32xf32>
    %87 = arith.addf %85, %86 : vector<8x32xf32>
    %88 = math.tanh %87 : vector<8x32xf32>
    %89 = arith.mulf %84, %88 : vector<8x32xf32>
    %c24_31 = arith.constant 24 : index
    %c0_32 = arith.constant 0 : index
    %90 = vector.load %arg15[%c24_31, %c0_32] : memref<64x32xf32, #tpu.memory_space<vmem>>, vector<8x32xf32>
    tpu.vector_store %arg15[%c24_31, %c0_32], %89 {strides = array<i32>} : memref<64x32xf32, #tpu.memory_space<vmem>>, vector<8x32xf32>,
    %cst_33 = arith.constant dense<0.000000e+00> : vector<8x128xf32>
    %91 = tpu.matmul %89, %8, %cst_33 {dimension_numbers = #tpu.dot_dimension_numbers<[1], [0], [0], [1], [0, 0, 1, 1], [], []>} : vector<8x32xf32>, vector<32x128xf32>, vector<8x128xf32> -> vector<8x128xf32>
    %c32 = arith.constant 32 : index
    %c0_34 = arith.constant 0 : index
    %92 = vector.load %arg14[%c32, %c0_34] : memref<64x128xf32, #tpu.memory_space<vmem>>, vector<8x128xf32>
    %93 = arith.addf %91, %92 : vector<8x128xf32>
    %94 = vector.extract_strided_slice %93 {offsets = [0, 0], sizes = [8, 96], strides = [1, 1]} : vector<8x128xf32> to vector<8x96xf32>
    %95 = arith.negf %94 : vector<8x96xf32>
    %96 = math.exp %95 : vector<8x96xf32>
    %cst_35 = arith.constant 1.000000e+00 : f32
    %97 = vector.broadcast %cst_35 : f32 to vector<8x96xf32>
    %98 = arith.addf %97, %96 : vector<8x96xf32>
    %99 = arith.divf %97, %98 : vector<8x96xf32>
    %100 = vector.extract_strided_slice %93 {offsets = [0, 96], sizes = [8, 32], strides = [1, 1]} : vector<8x128xf32> to vector<8x32xf32>
    %101 = math.tanh %100 : vector<8x32xf32>
    %102 = vector.extract_strided_slice %99 {offsets = [0, 0], sizes = [8, 32], strides = [1, 1]} : vector<8x96xf32> to vector<8x32xf32>
    %103 = vector.extract_strided_slice %99 {offsets = [0, 32], sizes = [8, 32], strides = [1, 1]} : vector<8x96xf32> to vector<8x32xf32>
    %104 = vector.extract_strided_slice %99 {offsets = [0, 64], sizes = [8, 32], strides = [1, 1]} : vector<8x96xf32> to vector<8x32xf32>
    %105 = arith.mulf %103, %87 : vector<8x32xf32>
    %106 = arith.mulf %102, %101 : vector<8x32xf32>
    %107 = arith.addf %105, %106 : vector<8x32xf32>
    %108 = math.tanh %107 : vector<8x32xf32>
    %109 = arith.mulf %104, %108 : vector<8x32xf32>
    %c32_36 = arith.constant 32 : index
    %c0_37 = arith.constant 0 : index
    %110 = vector.load %arg15[%c32_36, %c0_37] : memref<64x32xf32, #tpu.memory_space<vmem>>, vector<8x32xf32>
    tpu.vector_store %arg15[%c32_36, %c0_37], %109 {strides = array<i32>} : memref<64x32xf32, #tpu.memory_space<vmem>>, vector<8x32xf32>,
    %cst_38 = arith.constant dense<0.000000e+00> : vector<8x128xf32>
    %111 = tpu.matmul %109, %8, %cst_38 {dimension_numbers = #tpu.dot_dimension_numbers<[1], [0], [0], [1], [0, 0, 1, 1], [], []>} : vector<8x32xf32>, vector<32x128xf32>, vector<8x128xf32> -> vector<8x128xf32>
    %c40 = arith.constant 40 : index
    %c0_39 = arith.constant 0 : index
    %112 = vector.load %arg14[%c40, %c0_39] : memref<64x128xf32, #tpu.memory_space<vmem>>, vector<8x128xf32>
    %113 = arith.addf %111, %112 : vector<8x128xf32>
    %114 = vector.extract_strided_slice %113 {offsets = [0, 0], sizes = [8, 96], strides = [1, 1]} : vector<8x128xf32> to vector<8x96xf32>
    %115 = arith.negf %114 : vector<8x96xf32>
    %116 = math.exp %115 : vector<8x96xf32>
    %cst_40 = arith.constant 1.000000e+00 : f32
    %117 = vector.broadcast %cst_40 : f32 to vector<8x96xf32>
    %118 = arith.addf %117, %116 : vector<8x96xf32>
    %119 = arith.divf %117, %118 : vector<8x96xf32>
    %120 = vector.extract_strided_slice %113 {offsets = [0, 96], sizes = [8, 32], strides = [1, 1]} : vector<8x128xf32> to vector<8x32xf32>
    %121 = math.tanh %120 : vector<8x32xf32>
    %122 = vector.extract_strided_slice %119 {offsets = [0, 0], sizes = [8, 32], strides = [1, 1]} : vector<8x96xf32> to vector<8x32xf32>
    %123 = vector.extract_strided_slice %119 {offsets = [0, 32], sizes = [8, 32], strides = [1, 1]} : vector<8x96xf32> to vector<8x32xf32>
    %124 = vector.extract_strided_slice %119 {offsets = [0, 64], sizes = [8, 32], strides = [1, 1]} : vector<8x96xf32> to vector<8x32xf32>
    %125 = arith.mulf %123, %107 : vector<8x32xf32>
    %126 = arith.mulf %122, %121 : vector<8x32xf32>
    %127 = arith.addf %125, %126 : vector<8x32xf32>
    %128 = math.tanh %127 : vector<8x32xf32>
    %129 = arith.mulf %124, %128 : vector<8x32xf32>
    %c40_41 = arith.constant 40 : index
    %c0_42 = arith.constant 0 : index
    %130 = vector.load %arg15[%c40_41, %c0_42] : memref<64x32xf32, #tpu.memory_space<vmem>>, vector<8x32xf32>
    tpu.vector_store %arg15[%c40_41, %c0_42], %129 {strides = array<i32>} : memref<64x32xf32, #tpu.memory_space<vmem>>, vector<8x32xf32>,
    %cst_43 = arith.constant dense<0.000000e+00> : vector<8x128xf32>
    %131 = tpu.matmul %129, %8, %cst_43 {dimension_numbers = #tpu.dot_dimension_numbers<[1], [0], [0], [1], [0, 0, 1, 1], [], []>} : vector<8x32xf32>, vector<32x128xf32>, vector<8x128xf32> -> vector<8x128xf32>
    %c48 = arith.constant 48 : index
    %c0_44 = arith.constant 0 : index
    %132 = vector.load %arg14[%c48, %c0_44] : memref<64x128xf32, #tpu.memory_space<vmem>>, vector<8x128xf32>
    %133 = arith.addf %131, %132 : vector<8x128xf32>
    %134 = vector.extract_strided_slice %133 {offsets = [0, 0], sizes = [8, 96], strides = [1, 1]} : vector<8x128xf32> to vector<8x96xf32>
    %135 = arith.negf %134 : vector<8x96xf32>
    %136 = math.exp %135 : vector<8x96xf32>
    %cst_45 = arith.constant 1.000000e+00 : f32
    %137 = vector.broadcast %cst_45 : f32 to vector<8x96xf32>
    %138 = arith.addf %137, %136 : vector<8x96xf32>
    %139 = arith.divf %137, %138 : vector<8x96xf32>
    %140 = vector.extract_strided_slice %133 {offsets = [0, 96], sizes = [8, 32], strides = [1, 1]} : vector<8x128xf32> to vector<8x32xf32>
    %141 = math.tanh %140 : vector<8x32xf32>
    %142 = vector.extract_strided_slice %139 {offsets = [0, 0], sizes = [8, 32], strides = [1, 1]} : vector<8x96xf32> to vector<8x32xf32>
    %143 = vector.extract_strided_slice %139 {offsets = [0, 32], sizes = [8, 32], strides = [1, 1]} : vector<8x96xf32> to vector<8x32xf32>
    %144 = vector.extract_strided_slice %139 {offsets = [0, 64], sizes = [8, 32], strides = [1, 1]} : vector<8x96xf32> to vector<8x32xf32>
    %145 = arith.mulf %143, %127 : vector<8x32xf32>
    %146 = arith.mulf %142, %141 : vector<8x32xf32>
    %147 = arith.addf %145, %146 : vector<8x32xf32>
    %148 = math.tanh %147 : vector<8x32xf32>
    %149 = arith.mulf %144, %148 : vector<8x32xf32>
    %c48_46 = arith.constant 48 : index
    %c0_47 = arith.constant 0 : index
    %150 = vector.load %arg15[%c48_46, %c0_47] : memref<64x32xf32, #tpu.memory_space<vmem>>, vector<8x32xf32>
    tpu.vector_store %arg15[%c48_46, %c0_47], %149 {strides = array<i32>} : memref<64x32xf32, #tpu.memory_space<vmem>>, vector<8x32xf32>,
    %cst_48 = arith.constant dense<0.000000e+00> : vector<8x128xf32>
    %151 = tpu.matmul %149, %8, %cst_48 {dimension_numbers = #tpu.dot_dimension_numbers<[1], [0], [0], [1], [0, 0, 1, 1], [], []>} : vector<8x32xf32>, vector<32x128xf32>, vector<8x128xf32> -> vector<8x128xf32>
    %c56 = arith.constant 56 : index
    %c0_49 = arith.constant 0 : index
    %152 = vector.load %arg14[%c56, %c0_49] : memref<64x128xf32, #tpu.memory_space<vmem>>, vector<8x128xf32>
    %153 = arith.addf %151, %152 : vector<8x128xf32>
    %154 = vector.extract_strided_slice %153 {offsets = [0, 0], sizes = [8, 96], strides = [1, 1]} : vector<8x128xf32> to vector<8x96xf32>
    %155 = arith.negf %154 : vector<8x96xf32>
    %156 = math.exp %155 : vector<8x96xf32>
    %cst_50 = arith.constant 1.000000e+00 : f32
    %157 = vector.broadcast %cst_50 : f32 to vector<8x96xf32>
    %158 = arith.addf %157, %156 : vector<8x96xf32>
    %159 = arith.divf %157, %158 : vector<8x96xf32>
    %160 = vector.extract_strided_slice %153 {offsets = [0, 96], sizes = [8, 32], strides = [1, 1]} : vector<8x128xf32> to vector<8x32xf32>
    %161 = math.tanh %160 : vector<8x32xf32>
    %162 = vector.extract_strided_slice %159 {offsets = [0, 0], sizes = [8, 32], strides = [1, 1]} : vector<8x96xf32> to vector<8x32xf32>
    %163 = vector.extract_strided_slice %159 {offsets = [0, 32], sizes = [8, 32], strides = [1, 1]} : vector<8x96xf32> to vector<8x32xf32>
    %164 = vector.extract_strided_slice %159 {offsets = [0, 64], sizes = [8, 32], strides = [1, 1]} : vector<8x96xf32> to vector<8x32xf32>
    %165 = arith.mulf %163, %147 : vector<8x32xf32>
    %166 = arith.mulf %162, %161 : vector<8x32xf32>
    %167 = arith.addf %165, %166 : vector<8x32xf32>
    %168 = math.tanh %167 : vector<8x32xf32>
    %169 = arith.mulf %164, %168 : vector<8x32xf32>
    %c56_51 = arith.constant 56 : index
    %c0_52 = arith.constant 0 : index
    %170 = vector.load %arg15[%c56_51, %c0_52] : memref<64x32xf32, #tpu.memory_space<vmem>>, vector<8x32xf32>
    tpu.vector_store %arg15[%c56_51, %c0_52], %169 {strides = array<i32>} : memref<64x32xf32, #tpu.memory_space<vmem>>, vector<8x32xf32>,
    %c0_53 = arith.constant 0 : index
    %c0_54 = arith.constant 0 : index
    %171 = vector.load %arg15[%c0_53, %c0_54] : memref<64x32xf32, #tpu.memory_space<vmem>>, vector<64x32xf32>
    %c0_55 = arith.constant 0 : index
    %c0_56 = arith.constant 0 : index
    %172 = vector.load %arg5[%c0_55, %c0_56] : memref<32x128xf32, #tpu.memory_space<vmem>>, vector<32x128xf32>
    %cst_57 = arith.constant dense<0.000000e+00> : vector<64x128xf32>
    %173 = tpu.matmul %171, %172, %cst_57 {dimension_numbers = #tpu.dot_dimension_numbers<[1], [0], [0], [1], [0, 0, 1, 1], [], []>} : vector<64x32xf32>, vector<32x128xf32>, vector<64x128xf32> -> vector<64x128xf32>
    %c0_58 = arith.constant 0 : index
    %c0_59 = arith.constant 0 : index
    %174 = vector.load %arg7[%c0_58, %c0_59] : memref<1x128xf32, #tpu.memory_space<vmem>>, vector<1x128xf32>
    %175 = vector.broadcast %174 : vector<1x128xf32> to vector<64x128xf32>
    %176 = arith.addf %173, %175 : vector<64x128xf32>
    %c0_60 = arith.constant 0 : index
    %c0_61 = arith.constant 0 : index
    %177 = vector.load %arg6[%c0_60, %c0_61] : memref<32x128xf32, #tpu.memory_space<vmem>>, vector<32x128xf32>
    %cst_62 = arith.constant dense<0.000000e+00> : vector<64x128xf32>
    %178 = tpu.matmul %171, %177, %cst_62 {dimension_numbers = #tpu.dot_dimension_numbers<[1], [0], [0], [1], [0, 0, 1, 1], [], []>} : vector<64x32xf32>, vector<32x128xf32>, vector<64x128xf32> -> vector<64x128xf32>
    %179 = vector.extract_strided_slice %176 {offsets = [0, 0], sizes = [8, 128], strides = [1, 1]} : vector<64x128xf32> to vector<8x128xf32>
    %180 = vector.extract_strided_slice %178 {offsets = [56, 0], sizes = [8, 128], strides = [1, 1]} : vector<64x128xf32> to vector<8x128xf32>
    %181 = arith.addf %179, %180 : vector<8x128xf32>
    %c0_63 = arith.constant 0 : index
    %c0_64 = arith.constant 0 : index
    %182 = vector.load %arg14[%c0_63, %c0_64] : memref<64x128xf32, #tpu.memory_space<vmem>>, vector<8x128xf32>
    tpu.vector_store %arg14[%c0_63, %c0_64], %181 {strides = array<i32>} : memref<64x128xf32, #tpu.memory_space<vmem>>, vector<8x128xf32>,
    %183 = vector.extract_strided_slice %176 {offsets = [8, 0], sizes = [8, 128], strides = [1, 1]} : vector<64x128xf32> to vector<8x128xf32>
    %184 = vector.extract_strided_slice %178 {offsets = [48, 0], sizes = [8, 128], strides = [1, 1]} : vector<64x128xf32> to vector<8x128xf32>
    %185 = arith.addf %183, %184 : vector<8x128xf32>
    %c8_65 = arith.constant 8 : index
    %c0_66 = arith.constant 0 : index
    %186 = vector.load %arg14[%c8_65, %c0_66] : memref<64x128xf32, #tpu.memory_space<vmem>>, vector<8x128xf32>
    tpu.vector_store %arg14[%c8_65, %c0_66], %185 {strides = array<i32>} : memref<64x128xf32, #tpu.memory_space<vmem>>, vector<8x128xf32>,
    %187 = vector.extract_strided_slice %176 {offsets = [16, 0], sizes = [8, 128], strides = [1, 1]} : vector<64x128xf32> to vector<8x128xf32>
    %188 = vector.extract_strided_slice %178 {offsets = [40, 0], sizes = [8, 128], strides = [1, 1]} : vector<64x128xf32> to vector<8x128xf32>
    %189 = arith.addf %187, %188 : vector<8x128xf32>
    %c16_67 = arith.constant 16 : index
    %c0_68 = arith.constant 0 : index
    %190 = vector.load %arg14[%c16_67, %c0_68] : memref<64x128xf32, #tpu.memory_space<vmem>>, vector<8x128xf32>
    tpu.vector_store %arg14[%c16_67, %c0_68], %189 {strides = array<i32>} : memref<64x128xf32, #tpu.memory_space<vmem>>, vector<8x128xf32>,
    %191 = vector.extract_strided_slice %176 {offsets = [24, 0], sizes = [8, 128], strides = [1, 1]} : vector<64x128xf32> to vector<8x128xf32>
    %192 = vector.extract_strided_slice %178 {offsets = [32, 0], sizes = [8, 128], strides = [1, 1]} : vector<64x128xf32> to vector<8x128xf32>
    %193 = arith.addf %191, %192 : vector<8x128xf32>
    %c24_69 = arith.constant 24 : index
    %c0_70 = arith.constant 0 : index
    %194 = vector.load %arg14[%c24_69, %c0_70] : memref<64x128xf32, #tpu.memory_space<vmem>>, vector<8x128xf32>
    tpu.vector_store %arg14[%c24_69, %c0_70], %193 {strides = array<i32>} : memref<64x128xf32, #tpu.memory_space<vmem>>, vector<8x128xf32>,
    %195 = vector.extract_strided_slice %176 {offsets = [32, 0], sizes = [8, 128], strides = [1, 1]} : vector<64x128xf32> to vector<8x128xf32>
    %196 = vector.extract_strided_slice %178 {offsets = [24, 0], sizes = [8, 128], strides = [1, 1]} : vector<64x128xf32> to vector<8x128xf32>
    %197 = arith.addf %195, %196 : vector<8x128xf32>
    %c32_71 = arith.constant 32 : index
    %c0_72 = arith.constant 0 : index
    %198 = vector.load %arg14[%c32_71, %c0_72] : memref<64x128xf32, #tpu.memory_space<vmem>>, vector<8x128xf32>
    tpu.vector_store %arg14[%c32_71, %c0_72], %197 {strides = array<i32>} : memref<64x128xf32, #tpu.memory_space<vmem>>, vector<8x128xf32>,
    %199 = vector.extract_strided_slice %176 {offsets = [40, 0], sizes = [8, 128], strides = [1, 1]} : vector<64x128xf32> to vector<8x128xf32>
    %200 = vector.extract_strided_slice %178 {offsets = [16, 0], sizes = [8, 128], strides = [1, 1]} : vector<64x128xf32> to vector<8x128xf32>
    %201 = arith.addf %199, %200 : vector<8x128xf32>
    %c40_73 = arith.constant 40 : index
    %c0_74 = arith.constant 0 : index
    %202 = vector.load %arg14[%c40_73, %c0_74] : memref<64x128xf32, #tpu.memory_space<vmem>>, vector<8x128xf32>
    tpu.vector_store %arg14[%c40_73, %c0_74], %201 {strides = array<i32>} : memref<64x128xf32, #tpu.memory_space<vmem>>, vector<8x128xf32>,
    %203 = vector.extract_strided_slice %176 {offsets = [48, 0], sizes = [8, 128], strides = [1, 1]} : vector<64x128xf32> to vector<8x128xf32>
    %204 = vector.extract_strided_slice %178 {offsets = [8, 0], sizes = [8, 128], strides = [1, 1]} : vector<64x128xf32> to vector<8x128xf32>
    %205 = arith.addf %203, %204 : vector<8x128xf32>
    %c48_75 = arith.constant 48 : index
    %c0_76 = arith.constant 0 : index
    %206 = vector.load %arg14[%c48_75, %c0_76] : memref<64x128xf32, #tpu.memory_space<vmem>>, vector<8x128xf32>
    tpu.vector_store %arg14[%c48_75, %c0_76], %205 {strides = array<i32>} : memref<64x128xf32, #tpu.memory_space<vmem>>, vector<8x128xf32>,
    %207 = vector.extract_strided_slice %176 {offsets = [56, 0], sizes = [8, 128], strides = [1, 1]} : vector<64x128xf32> to vector<8x128xf32>
    %208 = vector.extract_strided_slice %178 {offsets = [0, 0], sizes = [8, 128], strides = [1, 1]} : vector<64x128xf32> to vector<8x128xf32>
    %209 = arith.addf %207, %208 : vector<8x128xf32>
    %c56_77 = arith.constant 56 : index
    %c0_78 = arith.constant 0 : index
    %210 = vector.load %arg14[%c56_77, %c0_78] : memref<64x128xf32, #tpu.memory_space<vmem>>, vector<8x128xf32>
    tpu.vector_store %arg14[%c56_77, %c0_78], %209 {strides = array<i32>} : memref<64x128xf32, #tpu.memory_space<vmem>>, vector<8x128xf32>,
    %c0_79 = arith.constant 0 : index
    %c0_80 = arith.constant 0 : index
    %211 = vector.load %arg8[%c0_79, %c0_80] : memref<32x128xf32, #tpu.memory_space<vmem>>, vector<32x128xf32>
    %cst_81 = arith.constant 0.000000e+00 : f32
    %212 = vector.broadcast %cst_81 : f32 to vector<8x32xf32>
    %cst_82 = arith.constant 0.000000e+00 : f32
    %213 = vector.broadcast %cst_82 : f32 to vector<8x32xf32>
    %cst_83 = arith.constant 0.000000e+00 : f32
    %214 = vector.broadcast %cst_83 : f32 to vector<8x32xf32>
    %cst_84 = arith.constant 0xFF800000 : f32
    %215 = vector.broadcast %cst_84 : f32 to vector<8x32xf32>
    %cst_85 = arith.constant dense<0.000000e+00> : vector<8x128xf32>
    %216 = tpu.matmul %212, %211, %cst_85 {dimension_numbers = #tpu.dot_dimension_numbers<[1], [0], [0], [1], [0, 0, 1, 1], [], []>} : vector<8x32xf32>, vector<32x128xf32>, vector<8x128xf32> -> vector<8x128xf32>
    %c0_86 = arith.constant 0 : index
    %c0_87 = arith.constant 0 : index
    %217 = vector.load %arg14[%c0_86, %c0_87] : memref<64x128xf32, #tpu.memory_space<vmem>>, vector<8x128xf32>
    %218 = arith.addf %216, %217 : vector<8x128xf32>
    %219 = vector.extract_strided_slice %218 {offsets = [0, 0], sizes = [8, 96], strides = [1, 1]} : vector<8x128xf32> to vector<8x96xf32>
    %220 = arith.negf %219 : vector<8x96xf32>
    %221 = math.exp %220 : vector<8x96xf32>
    %cst_88 = arith.constant 1.000000e+00 : f32
    %222 = vector.broadcast %cst_88 : f32 to vector<8x96xf32>
    %223 = arith.addf %222, %221 : vector<8x96xf32>
    %224 = arith.divf %222, %223 : vector<8x96xf32>
    %225 = vector.extract_strided_slice %218 {offsets = [0, 96], sizes = [8, 32], strides = [1, 1]} : vector<8x128xf32> to vector<8x32xf32>
    %226 = math.tanh %225 : vector<8x32xf32>
    %227 = vector.extract_strided_slice %224 {offsets = [0, 0], sizes = [8, 32], strides = [1, 1]} : vector<8x96xf32> to vector<8x32xf32>
    %228 = vector.extract_strided_slice %224 {offsets = [0, 32], sizes = [8, 32], strides = [1, 1]} : vector<8x96xf32> to vector<8x32xf32>
    %229 = vector.extract_strided_slice %224 {offsets = [0, 64], sizes = [8, 32], strides = [1, 1]} : vector<8x96xf32> to vector<8x32xf32>
    %230 = arith.mulf %228, %213 : vector<8x32xf32>
    %231 = arith.mulf %227, %226 : vector<8x32xf32>
    %232 = arith.addf %230, %231 : vector<8x32xf32>
    %233 = math.tanh %232 : vector<8x32xf32>
    %234 = arith.mulf %229, %233 : vector<8x32xf32>
    %235 = arith.addf %214, %234 : vector<8x32xf32>
    %236 = arith.maximumf %215, %234 : vector<8x32xf32>
    %cst_89 = arith.constant dense<0.000000e+00> : vector<8x128xf32>
    %237 = tpu.matmul %234, %211, %cst_89 {dimension_numbers = #tpu.dot_dimension_numbers<[1], [0], [0], [1], [0, 0, 1, 1], [], []>} : vector<8x32xf32>, vector<32x128xf32>, vector<8x128xf32> -> vector<8x128xf32>
    %c8_90 = arith.constant 8 : index
    %c0_91 = arith.constant 0 : index
    %238 = vector.load %arg14[%c8_90, %c0_91] : memref<64x128xf32, #tpu.memory_space<vmem>>, vector<8x128xf32>
    %239 = arith.addf %237, %238 : vector<8x128xf32>
    %240 = vector.extract_strided_slice %239 {offsets = [0, 0], sizes = [8, 96], strides = [1, 1]} : vector<8x128xf32> to vector<8x96xf32>
    %241 = arith.negf %240 : vector<8x96xf32>
    %242 = math.exp %241 : vector<8x96xf32>
    %cst_92 = arith.constant 1.000000e+00 : f32
    %243 = vector.broadcast %cst_92 : f32 to vector<8x96xf32>
    %244 = arith.addf %243, %242 : vector<8x96xf32>
    %245 = arith.divf %243, %244 : vector<8x96xf32>
    %246 = vector.extract_strided_slice %239 {offsets = [0, 96], sizes = [8, 32], strides = [1, 1]} : vector<8x128xf32> to vector<8x32xf32>
    %247 = math.tanh %246 : vector<8x32xf32>
    %248 = vector.extract_strided_slice %245 {offsets = [0, 0], sizes = [8, 32], strides = [1, 1]} : vector<8x96xf32> to vector<8x32xf32>
    %249 = vector.extract_strided_slice %245 {offsets = [0, 32], sizes = [8, 32], strides = [1, 1]} : vector<8x96xf32> to vector<8x32xf32>
    %250 = vector.extract_strided_slice %245 {offsets = [0, 64], sizes = [8, 32], strides = [1, 1]} : vector<8x96xf32> to vector<8x32xf32>
    %251 = arith.mulf %249, %232 : vector<8x32xf32>
    %252 = arith.mulf %248, %247 : vector<8x32xf32>
    %253 = arith.addf %251, %252 : vector<8x32xf32>
    %254 = math.tanh %253 : vector<8x32xf32>
    %255 = arith.mulf %250, %254 : vector<8x32xf32>
    %256 = arith.addf %235, %255 : vector<8x32xf32>
    %257 = arith.maximumf %236, %255 : vector<8x32xf32>
    %cst_93 = arith.constant dense<0.000000e+00> : vector<8x128xf32>
    %258 = tpu.matmul %255, %211, %cst_93 {dimension_numbers = #tpu.dot_dimension_numbers<[1], [0], [0], [1], [0, 0, 1, 1], [], []>} : vector<8x32xf32>, vector<32x128xf32>, vector<8x128xf32> -> vector<8x128xf32>
    %c16_94 = arith.constant 16 : index
    %c0_95 = arith.constant 0 : index
    %259 = vector.load %arg14[%c16_94, %c0_95] : memref<64x128xf32, #tpu.memory_space<vmem>>, vector<8x128xf32>
    %260 = arith.addf %258, %259 : vector<8x128xf32>
    %261 = vector.extract_strided_slice %260 {offsets = [0, 0], sizes = [8, 96], strides = [1, 1]} : vector<8x128xf32> to vector<8x96xf32>
    %262 = arith.negf %261 : vector<8x96xf32>
    %263 = math.exp %262 : vector<8x96xf32>
    %cst_96 = arith.constant 1.000000e+00 : f32
    %264 = vector.broadcast %cst_96 : f32 to vector<8x96xf32>
    %265 = arith.addf %264, %263 : vector<8x96xf32>
    %266 = arith.divf %264, %265 : vector<8x96xf32>
    %267 = vector.extract_strided_slice %260 {offsets = [0, 96], sizes = [8, 32], strides = [1, 1]} : vector<8x128xf32> to vector<8x32xf32>
    %268 = math.tanh %267 : vector<8x32xf32>
    %269 = vector.extract_strided_slice %266 {offsets = [0, 0], sizes = [8, 32], strides = [1, 1]} : vector<8x96xf32> to vector<8x32xf32>
    %270 = vector.extract_strided_slice %266 {offsets = [0, 32], sizes = [8, 32], strides = [1, 1]} : vector<8x96xf32> to vector<8x32xf32>
    %271 = vector.extract_strided_slice %266 {offsets = [0, 64], sizes = [8, 32], strides = [1, 1]} : vector<8x96xf32> to vector<8x32xf32>
    %272 = arith.mulf %270, %253 : vector<8x32xf32>
    %273 = arith.mulf %269, %268 : vector<8x32xf32>
    %274 = arith.addf %272, %273 : vector<8x32xf32>
    %275 = math.tanh %274 : vector<8x32xf32>
    %276 = arith.mulf %271, %275 : vector<8x32xf32>
    %277 = arith.addf %256, %276 : vector<8x32xf32>
    %278 = arith.maximumf %257, %276 : vector<8x32xf32>
    %cst_97 = arith.constant dense<0.000000e+00> : vector<8x128xf32>
    %279 = tpu.matmul %276, %211, %cst_97 {dimension_numbers = #tpu.dot_dimension_numbers<[1], [0], [0], [1], [0, 0, 1, 1], [], []>} : vector<8x32xf32>, vector<32x128xf32>, vector<8x128xf32> -> vector<8x128xf32>
    %c24_98 = arith.constant 24 : index
    %c0_99 = arith.constant 0 : index
    %280 = vector.load %arg14[%c24_98, %c0_99] : memref<64x128xf32, #tpu.memory_space<vmem>>, vector<8x128xf32>
    %281 = arith.addf %279, %280 : vector<8x128xf32>
    %282 = vector.extract_strided_slice %281 {offsets = [0, 0], sizes = [8, 96], strides = [1, 1]} : vector<8x128xf32> to vector<8x96xf32>
    %283 = arith.negf %282 : vector<8x96xf32>
    %284 = math.exp %283 : vector<8x96xf32>
    %cst_100 = arith.constant 1.000000e+00 : f32
    %285 = vector.broadcast %cst_100 : f32 to vector<8x96xf32>
    %286 = arith.addf %285, %284 : vector<8x96xf32>
    %287 = arith.divf %285, %286 : vector<8x96xf32>
    %288 = vector.extract_strided_slice %281 {offsets = [0, 96], sizes = [8, 32], strides = [1, 1]} : vector<8x128xf32> to vector<8x32xf32>
    %289 = math.tanh %288 : vector<8x32xf32>
    %290 = vector.extract_strided_slice %287 {offsets = [0, 0], sizes = [8, 32], strides = [1, 1]} : vector<8x96xf32> to vector<8x32xf32>
    %291 = vector.extract_strided_slice %287 {offsets = [0, 32], sizes = [8, 32], strides = [1, 1]} : vector<8x96xf32> to vector<8x32xf32>
    %292 = vector.extract_strided_slice %287 {offsets = [0, 64], sizes = [8, 32], strides = [1, 1]} : vector<8x96xf32> to vector<8x32xf32>
    %293 = arith.mulf %291, %274 : vector<8x32xf32>
    %294 = arith.mulf %290, %289 : vector<8x32xf32>
    %295 = arith.addf %293, %294 : vector<8x32xf32>
    %296 = math.tanh %295 : vector<8x32xf32>
    %297 = arith.mulf %292, %296 : vector<8x32xf32>
    %298 = arith.addf %277, %297 : vector<8x32xf32>
    %299 = arith.maximumf %278, %297 : vector<8x32xf32>
    %cst_101 = arith.constant dense<0.000000e+00> : vector<8x128xf32>
    %300 = tpu.matmul %297, %211, %cst_101 {dimension_numbers = #tpu.dot_dimension_numbers<[1], [0], [0], [1], [0, 0, 1, 1], [], []>} : vector<8x32xf32>, vector<32x128xf32>, vector<8x128xf32> -> vector<8x128xf32>
    %c32_102 = arith.constant 32 : index
    %c0_103 = arith.constant 0 : index
    %301 = vector.load %arg14[%c32_102, %c0_103] : memref<64x128xf32, #tpu.memory_space<vmem>>, vector<8x128xf32>
    %302 = arith.addf %300, %301 : vector<8x128xf32>
    %303 = vector.extract_strided_slice %302 {offsets = [0, 0], sizes = [8, 96], strides = [1, 1]} : vector<8x128xf32> to vector<8x96xf32>
    %304 = arith.negf %303 : vector<8x96xf32>
    %305 = math.exp %304 : vector<8x96xf32>
    %cst_104 = arith.constant 1.000000e+00 : f32
    %306 = vector.broadcast %cst_104 : f32 to vector<8x96xf32>
    %307 = arith.addf %306, %305 : vector<8x96xf32>
    %308 = arith.divf %306, %307 : vector<8x96xf32>
    %309 = vector.extract_strided_slice %302 {offsets = [0, 96], sizes = [8, 32], strides = [1, 1]} : vector<8x128xf32> to vector<8x32xf32>
    %310 = math.tanh %309 : vector<8x32xf32>
    %311 = vector.extract_strided_slice %308 {offsets = [0, 0], sizes = [8, 32], strides = [1, 1]} : vector<8x96xf32> to vector<8x32xf32>
    %312 = vector.extract_strided_slice %308 {offsets = [0, 32], sizes = [8, 32], strides = [1, 1]} : vector<8x96xf32> to vector<8x32xf32>
    %313 = vector.extract_strided_slice %308 {offsets = [0, 64], sizes = [8, 32], strides = [1, 1]} : vector<8x96xf32> to vector<8x32xf32>
    %314 = arith.mulf %312, %295 : vector<8x32xf32>
    %315 = arith.mulf %311, %310 : vector<8x32xf32>
    %316 = arith.addf %314, %315 : vector<8x32xf32>
    %317 = math.tanh %316 : vector<8x32xf32>
    %318 = arith.mulf %313, %317 : vector<8x32xf32>
    %319 = arith.addf %298, %318 : vector<8x32xf32>
    %320 = arith.maximumf %299, %318 : vector<8x32xf32>
    %cst_105 = arith.constant dense<0.000000e+00> : vector<8x128xf32>
    %321 = tpu.matmul %318, %211, %cst_105 {dimension_numbers = #tpu.dot_dimension_numbers<[1], [0], [0], [1], [0, 0, 1, 1], [], []>} : vector<8x32xf32>, vector<32x128xf32>, vector<8x128xf32> -> vector<8x128xf32>
    %c40_106 = arith.constant 40 : index
    %c0_107 = arith.constant 0 : index
    %322 = vector.load %arg14[%c40_106, %c0_107] : memref<64x128xf32, #tpu.memory_space<vmem>>, vector<8x128xf32>
    %323 = arith.addf %321, %322 : vector<8x128xf32>
    %324 = vector.extract_strided_slice %323 {offsets = [0, 0], sizes = [8, 96], strides = [1, 1]} : vector<8x128xf32> to vector<8x96xf32>
    %325 = arith.negf %324 : vector<8x96xf32>
    %326 = math.exp %325 : vector<8x96xf32>
    %cst_108 = arith.constant 1.000000e+00 : f32
    %327 = vector.broadcast %cst_108 : f32 to vector<8x96xf32>
    %328 = arith.addf %327, %326 : vector<8x96xf32>
    %329 = arith.divf %327, %328 : vector<8x96xf32>
    %330 = vector.extract_strided_slice %323 {offsets = [0, 96], sizes = [8, 32], strides = [1, 1]} : vector<8x128xf32> to vector<8x32xf32>
    %331 = math.tanh %330 : vector<8x32xf32>
    %332 = vector.extract_strided_slice %329 {offsets = [0, 0], sizes = [8, 32], strides = [1, 1]} : vector<8x96xf32> to vector<8x32xf32>
    %333 = vector.extract_strided_slice %329 {offsets = [0, 32], sizes = [8, 32], strides = [1, 1]} : vector<8x96xf32> to vector<8x32xf32>
    %334 = vector.extract_strided_slice %329 {offsets = [0, 64], sizes = [8, 32], strides = [1, 1]} : vector<8x96xf32> to vector<8x32xf32>
    %335 = arith.mulf %333, %316 : vector<8x32xf32>
    %336 = arith.mulf %332, %331 : vector<8x32xf32>
    %337 = arith.addf %335, %336 : vector<8x32xf32>
    %338 = math.tanh %337 : vector<8x32xf32>
    %339 = arith.mulf %334, %338 : vector<8x32xf32>
    %340 = arith.addf %319, %339 : vector<8x32xf32>
    %341 = arith.maximumf %320, %339 : vector<8x32xf32>
    %cst_109 = arith.constant dense<0.000000e+00> : vector<8x128xf32>
    %342 = tpu.matmul %339, %211, %cst_109 {dimension_numbers = #tpu.dot_dimension_numbers<[1], [0], [0], [1], [0, 0, 1, 1], [], []>} : vector<8x32xf32>, vector<32x128xf32>, vector<8x128xf32> -> vector<8x128xf32>
    %c48_110 = arith.constant 48 : index
    %c0_111 = arith.constant 0 : index
    %343 = vector.load %arg14[%c48_110, %c0_111] : memref<64x128xf32, #tpu.memory_space<vmem>>, vector<8x128xf32>
    %344 = arith.addf %342, %343 : vector<8x128xf32>
    %345 = vector.extract_strided_slice %344 {offsets = [0, 0], sizes = [8, 96], strides = [1, 1]} : vector<8x128xf32> to vector<8x96xf32>
    %346 = arith.negf %345 : vector<8x96xf32>
    %347 = math.exp %346 : vector<8x96xf32>
    %cst_112 = arith.constant 1.000000e+00 : f32
    %348 = vector.broadcast %cst_112 : f32 to vector<8x96xf32>
    %349 = arith.addf %348, %347 : vector<8x96xf32>
    %350 = arith.divf %348, %349 : vector<8x96xf32>
    %351 = vector.extract_strided_slice %344 {offsets = [0, 96], sizes = [8, 32], strides = [1, 1]} : vector<8x128xf32> to vector<8x32xf32>
    %352 = math.tanh %351 : vector<8x32xf32>
    %353 = vector.extract_strided_slice %350 {offsets = [0, 0], sizes = [8, 32], strides = [1, 1]} : vector<8x96xf32> to vector<8x32xf32>
    %354 = vector.extract_strided_slice %350 {offsets = [0, 32], sizes = [8, 32], strides = [1, 1]} : vector<8x96xf32> to vector<8x32xf32>
    %355 = vector.extract_strided_slice %350 {offsets = [0, 64], sizes = [8, 32], strides = [1, 1]} : vector<8x96xf32> to vector<8x32xf32>
    %356 = arith.mulf %354, %337 : vector<8x32xf32>
    %357 = arith.mulf %353, %352 : vector<8x32xf32>
    %358 = arith.addf %356, %357 : vector<8x32xf32>
    %359 = math.tanh %358 : vector<8x32xf32>
    %360 = arith.mulf %355, %359 : vector<8x32xf32>
    %361 = arith.addf %340, %360 : vector<8x32xf32>
    %362 = arith.maximumf %341, %360 : vector<8x32xf32>
    %cst_113 = arith.constant dense<0.000000e+00> : vector<8x128xf32>
    %363 = tpu.matmul %360, %211, %cst_113 {dimension_numbers = #tpu.dot_dimension_numbers<[1], [0], [0], [1], [0, 0, 1, 1], [], []>} : vector<8x32xf32>, vector<32x128xf32>, vector<8x128xf32> -> vector<8x128xf32>
    %c56_114 = arith.constant 56 : index
    %c0_115 = arith.constant 0 : index
    %364 = vector.load %arg14[%c56_114, %c0_115] : memref<64x128xf32, #tpu.memory_space<vmem>>, vector<8x128xf32>
    %365 = arith.addf %363, %364 : vector<8x128xf32>
    %366 = vector.extract_strided_slice %365 {offsets = [0, 0], sizes = [8, 96], strides = [1, 1]} : vector<8x128xf32> to vector<8x96xf32>
    %367 = arith.negf %366 : vector<8x96xf32>
    %368 = math.exp %367 : vector<8x96xf32>
    %cst_116 = arith.constant 1.000000e+00 : f32
    %369 = vector.broadcast %cst_116 : f32 to vector<8x96xf32>
    %370 = arith.addf %369, %368 : vector<8x96xf32>
    %371 = arith.divf %369, %370 : vector<8x96xf32>
    %372 = vector.extract_strided_slice %365 {offsets = [0, 96], sizes = [8, 32], strides = [1, 1]} : vector<8x128xf32> to vector<8x32xf32>
    %373 = math.tanh %372 : vector<8x32xf32>
    %374 = vector.extract_strided_slice %371 {offsets = [0, 0], sizes = [8, 32], strides = [1, 1]} : vector<8x96xf32> to vector<8x32xf32>
    %375 = vector.extract_strided_slice %371 {offsets = [0, 32], sizes = [8, 32], strides = [1, 1]} : vector<8x96xf32> to vector<8x32xf32>
    %376 = vector.extract_strided_slice %371 {offsets = [0, 64], sizes = [8, 32], strides = [1, 1]} : vector<8x96xf32> to vector<8x32xf32>
    %377 = arith.mulf %375, %358 : vector<8x32xf32>
    %378 = arith.mulf %374, %373 : vector<8x32xf32>
    %379 = arith.addf %377, %378 : vector<8x32xf32>
    %380 = math.tanh %379 : vector<8x32xf32>
    %381 = arith.mulf %376, %380 : vector<8x32xf32>
    %382 = arith.addf %361, %381 : vector<8x32xf32>
    %383 = arith.maximumf %362, %381 : vector<8x32xf32>
    %cst_117 = arith.constant 1.250000e-01 : f32
    %384 = vector.broadcast %cst_117 : f32 to vector<8x32xf32>
    %385 = arith.mulf %382, %384 : vector<8x32xf32>
    %386 = tpu.concatenate %383, %385 in 1 : vector<8x32xf32>, vector<8x32xf32> -> vector<8x64xf32>
    %c0_118 = arith.constant 0 : index
    %c0_119 = arith.constant 0 : index
    %387 = vector.load %arg9[%c0_118, %c0_119] : memref<64x128xf32, #tpu.memory_space<vmem>>, vector<64x128xf32>
    %cst_120 = arith.constant dense<0.000000e+00> : vector<8x128xf32>
    %388 = tpu.matmul %386, %387, %cst_120 {dimension_numbers = #tpu.dot_dimension_numbers<[1], [0], [0], [1], [0, 0, 1, 1], [], []>} : vector<8x64xf32>, vector<64x128xf32>, vector<8x128xf32> -> vector<8x128xf32>
    %c0_121 = arith.constant 0 : index
    %c0_122 = arith.constant 0 : index
    %389 = vector.load %arg10[%c0_121, %c0_122] : memref<1x128xf32, #tpu.memory_space<vmem>>, vector<1x128xf32>
    %390 = vector.broadcast %389 : vector<1x128xf32> to vector<8x128xf32>
    %391 = arith.addf %388, %390 : vector<8x128xf32>
    %cst_123 = arith.constant 0.000000e+00 : f32
    %392 = vector.broadcast %cst_123 : f32 to vector<8x128xf32>
    %393 = arith.maximumf %391, %392 : vector<8x128xf32>
    %394 = vector.extract_strided_slice %393 {offsets = [0, 0], sizes = [8, 64], strides = [1, 1]} : vector<8x128xf32> to vector<8x64xf32>
    %395 = arith.addf %386, %394 : vector<8x64xf32>
    %396 = vector.extract_strided_slice %393 {offsets = [0, 64], sizes = [8, 64], strides = [1, 1]} : vector<8x128xf32> to vector<8x64xf32>
    %397 = arith.addf %395, %396 : vector<8x64xf32>
    %c0_124 = arith.constant 0 : index
    %c0_125 = arith.constant 0 : index
    %398 = vector.load %arg11[%c0_124, %c0_125] : memref<64x1xf32, #tpu.memory_space<vmem>>, vector<64x1xf32>
    %cst_126 = arith.constant dense<0.000000e+00> : vector<8x1xf32>
    %399 = tpu.matmul %397, %398, %cst_126 {dimension_numbers = #tpu.dot_dimension_numbers<[1], [0], [0], [1], [0, 0, 1, 1], [], []>} : vector<8x64xf32>, vector<64x1xf32>, vector<8x1xf32> -> vector<8x1xf32>
    %c0_127 = arith.constant 0 : index
    %c0_128 = arith.constant 0 : index
    %400 = vector.load %arg12[%c0_127, %c0_128] : memref<1x1xf32, #tpu.memory_space<vmem>>, vector<1x1xf32>
    %401 = vector.broadcast %400 : vector<1x1xf32> to vector<8x1xf32>
    %402 = arith.addf %399, %401 : vector<8x1xf32>
    %c0_129 = arith.constant 0 : index
    %c0_130 = arith.constant 0 : index
    %c0_131 = arith.constant 0 : index
    %403 = vector.load %arg13[%c0_129, %c0_130, %c0_131] : memref<1x8x1xf32, #tpu.memory_space<vmem>>, vector<1x8x1xf32>
    %404 = vector.shape_cast %403 : vector<1x8x1xf32> to vector<8x1xf32>
    %405 = vector.shape_cast %402 : vector<8x1xf32> to vector<1x8x1xf32>
    tpu.vector_store %arg13[%c0_129, %c0_130, %c0_131], %405 {strides = array<i32>} : memref<1x8x1xf32, #tpu.memory_space<vmem>>, vector<1x8x1xf32>,
    return
  }
  func.func @transform_0(%arg0: i32) -> (i32, i32, i32) {
    %c0_i32 = arith.constant 0 : i32
    %c0_i32_0 = arith.constant 0 : i32
    %c0_i32_1 = arith.constant 0 : i32
    return %arg0, %c0_i32, %c0_i32_0 : i32, i32, i32
  }
  func.func @transform_1(%arg0: i32) -> (i32, i32) {
    %c0_i32 = arith.constant 0 : i32
    %c0_i32_0 = arith.constant 0 : i32
    %c0_i32_1 = arith.constant 0 : i32
    return %c0_i32, %c0_i32_0 : i32, i32
  }
  func.func @transform_2(%arg0: i32) -> (i32, i32) {
    %c0_i32 = arith.constant 0 : i32
    %c0_i32_0 = arith.constant 0 : i32
    %c0_i32_1 = arith.constant 0 : i32
    return %c0_i32, %c0_i32_0 : i32, i32
  }
  func.func @transform_3(%arg0: i32) -> (i32, i32) {
    %c0_i32 = arith.constant 0 : i32
    %c0_i32_0 = arith.constant 0 : i32
    %c0_i32_1 = arith.constant 0 : i32
    return %c0_i32, %c0_i32_0 : i32, i32
  }
  func.func @transform_4(%arg0: i32) -> (i32, i32) {
    %c0_i32 = arith.constant 0 : i32
    %c0_i32_0 = arith.constant 0 : i32
    %c0_i32_1 = arith.constant 0 : i32
    return %c0_i32, %c0_i32_0 : i32, i32
  }
  func.func @transform_5(%arg0: i32) -> (i32, i32) {
    %c0_i32 = arith.constant 0 : i32
    %c0_i32_0 = arith.constant 0 : i32
    %c0_i32_1 = arith.constant 0 : i32
    return %c0_i32, %c0_i32_0 : i32, i32
  }
  func.func @transform_6(%arg0: i32) -> (i32, i32) {
    %c0_i32 = arith.constant 0 : i32
    %c0_i32_0 = arith.constant 0 : i32
    %c0_i32_1 = arith.constant 0 : i32
    return %c0_i32, %c0_i32_0 : i32, i32
  }
  func.func @transform_7(%arg0: i32) -> (i32, i32) {
    %c0_i32 = arith.constant 0 : i32
    %c0_i32_0 = arith.constant 0 : i32
    %c0_i32_1 = arith.constant 0 : i32
    return %c0_i32, %c0_i32_0 : i32, i32
  }
  func.func @transform_8(%arg0: i32) -> (i32, i32) {
    %c0_i32 = arith.constant 0 : i32
    %c0_i32_0 = arith.constant 0 : i32
    %c0_i32_1 = arith.constant 0 : i32
    return %c0_i32, %c0_i32_0 : i32, i32
  }
  func.func @transform_9(%arg0: i32) -> (i32, i32) {
    %c0_i32 = arith.constant 0 : i32
    %c0_i32_0 = arith.constant 0 : i32
    %c0_i32_1 = arith.constant 0 : i32
    return %c0_i32, %c0_i32_0 : i32, i32
  }
  func.func @transform_10(%arg0: i32) -> (i32, i32) {
    %c0_i32 = arith.constant 0 : i32
    %c0_i32_0 = arith.constant 0 : i32
    %c0_i32_1 = arith.constant 0 : i32
    return %c0_i32, %c0_i32_0 : i32, i32
  }
  func.func @transform_11(%arg0: i32) -> (i32, i32) {
    %c0_i32 = arith.constant 0 : i32
    %c0_i32_0 = arith.constant 0 : i32
    %c0_i32_1 = arith.constant 0 : i32
    return %c0_i32, %c0_i32_0 : i32, i32
  }
  func.func @transform_12(%arg0: i32) -> (i32, i32, i32) {
    %c0_i32 = arith.constant 0 : i32
    %c0_i32_0 = arith.constant 0 : i32
    %c0_i32_1 = arith.constant 0 : i32
    return %arg0, %c0_i32, %c0_i32_0 : i32, i32, i32
  }
}

</mosaic_0001>

<bundles_post_ra>
// kernel: tpu_custom_call.1
= control target key start
LH: loop header
LB: loop body
LE: loop exit
PB: predicated region body
PF: predicated region fallthrough
CT: control target
= control target key end

     0   :  { %s3870_s0 = inlined_call_operand.vmem [shape: f32[1,64,64], index: 0, kind: input, shape index: {}]   ;;  %s3871_s1 = inlined_call_operand.hbm [shape: f32[64,128], index: 1, kind: input, shape index: {}]   ;;  %s3872_s2 = inlined_call_operand.vmem [shape: f32[1,128], index: 2, kind: input, shape index: {}]   ;;  %s3873_s3 = inlined_call_operand.hbm [shape: f32[32,128], index: 3, kind: input, shape index: {}]   ;;  %s3874_s4 = inlined_call_operand.hbm [shape: f32[32,128], index: 4, kind: input, shape index: {}]   ;;  %s3875_s5 = inlined_call_operand.hbm [shape: f32[32,128], index: 5, kind: input, shape index: {}]   ;;  %s3876_s6 = inlined_call_operand.vmem [shape: f32[1,128], index: 6, kind: input, shape index: {}]   ;;  %s3877_s7 = inlined_call_operand.hbm [shape: f32[32,128], index: 7, kind: input, shape index: {}]   ;;  %s3878_s8 = inlined_call_operand.hbm [shape: f32[64,128], index: 8, kind: input, shape index: {}]   ;;  %s3879_s9 = inlined_call_operand.vmem [shape: f32[1,128], index: 9, kind: input, shape index: {}]   ;;  %s3880_s10 = inlined_call_operand.vmem [shape: f32[64,1], index: 10, kind: input, shape index: {}]   ;;  %s3881_s11 = inlined_call_operand.<no memory space> [shape: f32[1,1], index: 11, kind: input, shape index: {}]   ;;  %s3882_s12 = inlined_call_operand.vmem [shape: f32[1,8,1], index: 12, kind: output, shape index: {}]  }
   0x1   :  { %v17_v0 = vstv %s3881_s11 }
   0x2   :  { %18 = vst [vmem:[#allocation4] sm:$0x1] %v17_v0 }
   0x3   :  { %19 = vsyncpa [#allocation6], 0 }
   0x4   :  { %20 = vsyncpa [#allocation8], 0 }
   0x5   :  { %21 = vsyncpa [#allocation11], 0 }
   0x6   :  { %22 = vsyncpa [#allocation14], 0  ;;  %s3312_s23 = smov [#allocation7]   ;;  %s3313_s25 = smov [#allocation10]  }
   0x7   :  { %s44_s24 = sshll.u32 %s3312_s23, 4  ;;  %s68_s26 = sshll.u32 %s3313_s25, 4  ;;  %s45_s24 = int_to_ptr.vmem [resolvable:$true] %s44_s24  ;;  %s3394_s26 = int_to_ptr.vmem [resolvable:$true] %s68_s26 }
   0x8   :  { %s3172_s29 = scalar_lea.hbm %s3873_s3, 512 }
   0x9   :  { %p3173_p0 = scmp.ne.s32.totalorder %s3873_s3, %s3172_s29  ;;  %p3176_p1 = scmp.lt.u32.totalorder %s3172_s29, %s3873_s3 }
   0xb   :  { %p3178_p2 = pnand %p3176_p1, %p3173_p0 }
   0xd   :  { %3181 = shalt.err (!%p3178_p2)
}
   0xe   :  { %s3182_s15 = scalar_lea.vmem %s45_s24, 512  ;;  %p3187_p4 = scmp.lt.s32.totalorder %s45_s24, %s45_s24 }
   0xf   :  { %p3183_p3 = scmp.ne.s32.totalorder %s45_s24, %s3182_s15  ;;  %p3188_p5 = scmp.lt.s32.totalorder %s3182_s15, %s3182_s15 }
  0x11   :  { %p3189_p6 = por %p3188_p5, %p3187_p4 }
  0x13   :  { %p3190_p7 = pnand %p3189_p6, %p3183_p3 }
  0x15   :  { %3193 = shalt.err (!%p3190_p7)
}
  0x16   :  { %s3314_s16 = smov 128   ;;  %s3315_s17 = smov 8  }
  0x17   :  { %50 = dma.hbm_to_vmem [thread:$0]  %s3873_s3, 512, %s45_s24, [#allocation8], %s3314_s16, %s3314_s16, %s3315_s17  }
  0x18   :  { %s3194_s22 = scalar_lea.hbm %s3875_s5, 512 }
  0x19   :  { %p3195_p8 = scmp.ne.s32.totalorder %s3875_s5, %s3194_s22  ;;  %p3198_p9 = scmp.lt.u32.totalorder %s3194_s22, %s3875_s5 }
  0x1b   :  { %p3200_p10 = pnand %p3198_p9, %p3195_p8 }
  0x1d   :  { %3203 = shalt.err (!%p3200_p10)
}
  0x1e   :  { %s3204_s29 = scalar_lea.vmem %s3394_s26, 512  ;;  %p3209_p12 = scmp.lt.s32.totalorder %s3394_s26, %s3394_s26 }
  0x1f   :  { %p3205_p11 = scmp.ne.s32.totalorder %s3394_s26, %s3204_s29  ;;  %p3210_p13 = scmp.lt.s32.totalorder %s3204_s29, %s3204_s29 }
  0x21   :  { %p3211_p0 = por %p3210_p13, %p3209_p12 }
  0x23   :  { %p3212_p1 = pnand %p3211_p0, %p3205_p11 }
  0x25   :  { %3215 = shalt.err (!%p3212_p1)
}
  0x26   :  { %74 = dma.hbm_to_vmem [thread:$0]  %s3875_s5, 512, %s3394_s26, [#allocation11], %s3314_s16, %s3314_s16, %s3315_s17  }
  0x27   :  { %s3316_s30 = smov [#allocation5]   ;;  %s3317_s11 = smov [#allocation9]  }
  0x28   :  { %s30_s13 = sshll.u32 %s3316_s30, 4  ;;  %s56_s14 = sshll.u32 %s3317_s11, 4  ;;  %s31_s13 = int_to_ptr.vmem [resolvable:$true] %s30_s13  ;;  %s3431_s14 = int_to_ptr.vmem [resolvable:$true] %s56_s14 }
  0x29   :  { %s3216_s19 = scalar_lea.hbm %s3871_s1, 1024 }
  0x2a   :  { %p3217_p2 = scmp.ne.s32.totalorder %s3871_s1, %s3216_s19  ;;  %p3220_p3 = scmp.lt.u32.totalorder %s3216_s19, %s3871_s1 }
  0x2c   :  { %p3222_p4 = pnand %p3220_p3, %p3217_p2 }
  0x2e   :  { %3225 = shalt.err (!%p3222_p4)
}
  0x2f   :  { %s3226_s5 = scalar_lea.vmem %s31_s13, 1024  ;;  %p3231_p6 = scmp.lt.s32.totalorder %s31_s13, %s31_s13 }
  0x30   :  { %p3227_p5 = scmp.ne.s32.totalorder %s31_s13, %s3226_s5  ;;  %p3232_p7 = scmp.lt.s32.totalorder %s3226_s5, %s3226_s5 }
  0x32   :  { %p3233_p8 = por %p3232_p7, %p3231_p6 }
  0x34   :  { %p3234_p9 = pnand %p3233_p8, %p3227_p5 }
  0x36   :  { %3237 = shalt.err (!%p3234_p9)
}
  0x37   :  { %36 = dma.hbm_to_vmem [thread:$0]  %s3871_s1, 1024, %s31_s13, [#allocation6], %s3314_s16, %s3314_s16, %s3315_s17  }
  0x38   :  { %s3238_s29 = scalar_lea.hbm %s3874_s4, 512 }
  0x39   :  { %p3239_p10 = scmp.ne.s32.totalorder %s3874_s4, %s3238_s29  ;;  %p3242_p11 = scmp.lt.u32.totalorder %s3238_s29, %s3874_s4 }
  0x3b   :  { %p3244_p12 = pnand %p3242_p11, %p3239_p10 }
  0x3d   :  { %3247 = shalt.err (!%p3244_p12)
}
  0x3e   :  { %s3248_s15 = scalar_lea.vmem %s3431_s14, 512  ;;  %p3253_p0 = scmp.lt.s32.totalorder %s3431_s14, %s3431_s14 }
  0x3f   :  { %p3249_p13 = scmp.ne.s32.totalorder %s3431_s14, %s3248_s15  ;;  %p3254_p1 = scmp.lt.s32.totalorder %s3248_s15, %s3248_s15 }
  0x41   :  { %p3255_p2 = por %p3254_p1, %p3253_p0 }
  0x43   :  { %p3256_p3 = pnand %p3255_p2, %p3249_p13 }
  0x45   :  { %3259 = shalt.err (!%p3256_p3)
}
  0x46   :  { %62 = dma.hbm_to_vmem [thread:$0]  %s3874_s4, 512, %s3431_s14, [#allocation8], %s3314_s16, %s3314_s16, %s3315_s17  }
  0x47   :  { %s3318_s18 = smov [#allocation12]   ;;  %s3319_s20 = smov [#allocation13]  }
  0x48   :  { %s82_s19 = sshll.u32 %s3318_s18, 4  ;;  %s94_s21 = sshll.u32 %s3319_s20, 4  ;;  %s83_s19 = int_to_ptr.vmem [resolvable:$true] %s82_s19  ;;  %s3468_s21 = int_to_ptr.vmem [resolvable:$true] %s94_s21 }
  0x49   :  { %s3260_s5 = scalar_lea.hbm %s3877_s7, 512 }
  0x4a   :  { %p3261_p4 = scmp.ne.s32.totalorder %s3877_s7, %s3260_s5  ;;  %p3264_p5 = scmp.lt.u32.totalorder %s3260_s5, %s3877_s7 }
  0x4c   :  { %p3266_p6 = pnand %p3264_p5, %p3261_p4 }
  0x4e   :  { %3269 = shalt.err (!%p3266_p6)
}
  0x4f   :  { %s3270_s4 = scalar_lea.vmem %s83_s19, 512  ;;  %p3275_p8 = scmp.lt.s32.totalorder %s83_s19, %s83_s19 }
  0x50   :  { %p3271_p7 = scmp.ne.s32.totalorder %s83_s19, %s3270_s4  ;;  %p3276_p9 = scmp.lt.s32.totalorder %s3270_s4, %s3270_s4 }
  0x52   :  { %p3277_p10 = por %p3276_p9, %p3275_p8 }
  0x54   :  { %p3278_p11 = pnand %p3277_p10, %p3271_p7 }
  0x56   :  { %3281 = shalt.err (!%p3278_p11)
}
  0x57   :  { %88 = dma.hbm_to_vmem [thread:$0]  %s3877_s7, 512, %s83_s19, [#allocation11], %s3314_s16, %s3314_s16, %s3315_s17  }
  0x58   :  { %s3282_s30 = scalar_lea.hbm %s3878_s8, 1024 }
  0x59   :  { %p3283_p12 = scmp.ne.s32.totalorder %s3878_s8, %s3282_s30  ;;  %p3286_p13 = scmp.lt.u32.totalorder %s3282_s30, %s3878_s8 }
  0x5b   :  { %p3288_p0 = pnand %p3286_p13, %p3283_p12 }
  0x5d   :  { %3291 = shalt.err (!%p3288_p0)
}
  0x5e   :  { %s3292_s18 = scalar_lea.vmem %s3468_s21, 1024  ;;  %p3297_p2 = scmp.lt.s32.totalorder %s3468_s21, %s3468_s21 }
  0x5f   :  { %p3293_p1 = scmp.ne.s32.totalorder %s3468_s21, %s3292_s18  ;;  %p3298_p3 = scmp.lt.s32.totalorder %s3292_s18, %s3292_s18 }
  0x61   :  { %p3299_p4 = por %p3298_p3, %p3297_p2 }
  0x63   :  { %p3300_p5 = pnand %p3299_p4, %p3293_p1 }
  0x65   :  { %3303 = shalt.err (!%p3300_p5)
}
  0x66   :  { %100 = dma.hbm_to_vmem [thread:$0]  %s3878_s8, 1024, %s3468_s21, [#allocation14], %s3314_s16, %s3314_s16, %s3315_s17  }
  0x67   :  { %3304 = dma.done.wait [#allocation6], 1024  }
  0x68   :  { %3305 = vsyncadd [#allocation6], 4294966272 }
  0x69   :  { %3306 = dma.done.wait [#allocation8], 1024  }
  0x6a   :  { %3307 = vsyncadd [#allocation8], 4294966272 }
  0x6b   :  { %3308 = dma.done.wait [#allocation11], 1024  }
  0x6c   :  { %3309 = vsyncadd [#allocation11], 4294966272 }
  0x6d   :  { %3310 = dma.done.wait [#allocation14], 1024  }
  0x6e   :  { %3311 = vsyncadd [#allocation14], 4294966272  ;;  %v3320_v1 = vmov 0.0|0.0   ;;  %vm3321_vm0 = vmmov 0   ;;  %v3322_v2 = vmov 0.0   ;;  %v133_v3 = vld [vmem:[#allocation5] sm:$0xff] }
  0x6f   :  { %2894 = vmatprep.subr.bf16.mxu1 %v3320_v1  ;;  %2632 = vmatprep.mubr.msk.f32.mxu1 %vm3321_vm0, %v3322_v2  ;;  %v134_v4 = vld [vmem:[#allocation5 + $0x8] sm:$0xff]  ;;  %v135_v5 = vld [vmem:[#allocation5 + $0x10] sm:$0xff]  ;;  %v136_v7 = vld [vmem:[#allocation5 + $0x18] sm:$0xff]  ;;  %vm148_vm1 = vcmask 523264   ;;  %s3323_s23 = smov 32   ;;  %vm291_vm2 = vcmask 261120  }
  0x70   :  { %v2878_v6 = vpack.c.bf16 %v134_v4, %v133_v3  ;;  %v137_v8 = vld [vmem:[#allocation5 + $0x20] sm:$0xff]  ;;  %v2882_v9 = vpack.c.bf16 %v136_v7, %v135_v5  ;;  %v138_v10 = vld [vmem:[#allocation5 + $0x28] sm:$0xff]  ;;  %v288_v15 = vld [vmem:[#allocation7 + $0x10] sm:$0xff]  ;;  %vm2388_vm3 = vcmask 7168  }
  0x71   :  { %v286_v11 = vld [vmem:[#allocation7] sm:$0xff]  ;;  %v287_v12 = vld [vmem:[#allocation7 + $0x8] sm:$0xff]  ;;  %v289_v16 = vld [vmem:[#allocation7 + $0x18] sm:$0xff]  ;;  %v2886_v17 = vpack.c.bf16 %v138_v10, %v137_v8 }
  0x72   :  { %2879 = vmatprep.subr.bf16.mxu0 %v2878_v6  ;;  %v3508_v13 = vpack.c.bf16 %v287_v12, %v286_v11  ;;  %v125_v14 = vld [vmem:[%s3870_s0] sm:$0xff]  ;;  %v3515_v18 = vpack.c.bf16 %v289_v16, %v288_v15  ;;  %v139_v19 = vld [vmem:[#allocation5 + $0x30] sm:$0xff]  ;;  %v126_v22 = vld [vmem:[%s3870_s0 + $0x8] sm:$0xff] }
  0x73   :  { %2881 = vmatpush3.bf16.msra.mxu0 %v2878_v6  ;;  %2612 = vmatprep.mubr.msk.f32.mxu0 %vm148_vm1, %v125_v14  ;;  %v140_v20 = vld [vmem:[#allocation5 + $0x38] sm:$0xff]  ;;  %v127_v58 = vld [vmem:[%s3870_s0 + $0x10] sm:$0xff] }
  0x74   :  { %2883 = vmatprep.subr.bf16.mxu0 %v2882_v9  ;;  %2896 = vmatpush3.bf16.msra.mxu1 %v3508_v13  ;;  %v2890_v21 = vpack.c.bf16 %v140_v20, %v139_v19  ;;  %v3539_v25 = vld [vmem:[%s3872_s2] ss:$0 sm:$0xff]  ;;  %s3324_s2 = smov 64   ;;  %v128_v59 = vld [vmem:[%s3870_s0 + $0x18] sm:$0xff] }
  0x75   :  { %2897 = vmatprep.subr.bf16.mxu1 %v3320_v1  ;;  %v129_v20 = vld [vmem:[%s3870_s0 + $0x20] sm:$0xff] }
  0x77   :  { %2885 = vmatpush3.bf16.msra.mxu0 %v2882_v9 }
  0x78   :  { %2887 = vmatprep.subr.bf16.mxu0 %v2886_v17  ;;  %2899 = vmatpush3.bf16.msra.mxu1 %v3515_v18 }
  0x79   :  { %2900 = vmatprep.subr.bf16.mxu1 %v3320_v1 }
  0x7b   :  { %2889 = vmatpush3.bf16.msra.mxu0 %v2886_v17  ;;  %2633 = vmatmul.mubr.f32.vlgmr.msra.gmra.mrb[0].mxu1 %v3322_v2 }
  0x7c   :  { %2891 = vmatprep.subr.bf16.mxu0 %v2890_v21  ;;  %2902 = vmatpush3.bf16.msra.mxu1 %v3508_v13 }
  0x7d   :  { %2903 = vmatprep.subr.bf16.mxu1 %v3320_v1  ;;  %2643 = vmatprep.mubr.msk.f32.mxu1 %vm3321_vm0, %v3322_v2 }
  0x7f   :  { %2893 = vmatpush3.bf16.msra.mxu0 %v2890_v21  ;;  %v130_v21 = vld [vmem:[%s3870_s0 + $0x28] sm:$0xff] }
  0x80   :  { %2905 = vmatpush3.bf16.msra.mxu1 %v3515_v18  ;;  %2912 = vmatprep.subr.bf16.mxu0 %v3320_v1 }
  0x81   :  { %2906 = vmatprep.subr.bf16.mxu1 %v3320_v1 }
  0x82   :  { %2613 = vmatmul.mubr.msk.f32.vlgmr.msra.gmra.mrb[0].mxu0 %vm148_vm1, %v126_v22  ;;  %v131_v22 = vld [vmem:[%s3870_s0 + $0x30] sm:$0xff] }
  0x83   :  { %2914 = vmatpush3.bf16.msra.mxu0 %v3508_v13  ;;  %2615 = vmatprep.mubr.msk.f32.mxu0 %vm148_vm1, %v127_v58 }
  0x84   :  { %2915 = vmatprep.subr.bf16.mxu0 %v3320_v1 }
  0x86   :  { %2616 = vmatmul.mubr.msk.f32.gmra.mrb[2].mxu0 %vm148_vm1, %v128_v59 }
  0x87   :  { %2917 = vmatpush3.bf16.msra.mxu0 %v3515_v18  ;;  %2618 = vmatprep.mubr.msk.f32.mxu0 %vm148_vm1, %v129_v20 }
  0x88   :  { %2924 = vmatprep.subr.bf16.mxu0 %v3320_v1 }
  0x8a   :  { %2619 = vmatmul.mubr.msk.f32.gmra.mrb[4].mxu0 %vm148_vm1, %v130_v21  ;;  %v1116_v21 = vld [vmem:[#allocation9] sm:$0xff] }
  0x8b   :  { %2621 = vmatprep.mubr.msk.f32.mxu0 %vm148_vm1, %v131_v22  ;;  %v1117_v22 = vld [vmem:[#allocation9 + $0x8] sm:$0xff] }
 0x14e   :  { %v361_v23 = vpop.f32.mrb[0].mxu1 }
 0x14f   :  { %v2634_v24 = vpop.f32.mrb[1].mxu1 }
 0x155   :  { %v2614_v26 = vpop.f32.mrb[0].mxu0 }
 0x156   :  { %v239_v27 = vpop.f32.mrb[1].mxu0  ;;  %v245_v44 = vadd.f32 %v2614_v26, %v3539_v25 }
 0x157   :  { %v240_v28 = vadd.f32 %v3539_v25, %v239_v27 }
 0x159   :  { %v362_v29 = vadd.f32 %v361_v23, %v240_v28  ;;  %v2617_v63 = vpop.f32.mrb[2].mxu0  ;;  %v132_v23 = vld [vmem:[%s3870_s0 + $0x38] sm:$0xff] }
 0x15a   :  { %v249_v0 = vpop.f32.mrb[3].mxu0  ;;  %2622 = vmatmul.mubr.msk.f32.gmra.mrb[6].mxu0 %vm148_vm1, %v132_v23  ;;  %v2942_v23 = vpack.c.bf16 %v1117_v22, %v1116_v21 }
 0x15b   :  { %3044 = vtanh.f32 %v362_v29  ;;  %v2407_v31 = vmul.f32 -1.442695, %v362_v29  ;;  %v250_v4 = vadd.f32 %v3539_v25, %v249_v0  ;;  %2665 = vmatprep.mubr.msk.f32.mxu0 %vm3321_vm0, %v3322_v2 }
 0x15d   :  { %3046 = vpow2.f32 %v2407_v31  ;;  %v3598_v28 = vpop.f32.mrb[4].mxu0 }
 0x15e   :  { %v259_v29 = vpop.f32.mrb[5].mxu0 }
 0x165   :  { %v3045_v30 = vpop.eup %3044 }
 0x166   :  { %374 = vrot.lane.b32.xlu0 %v3045_v30, %s3323_s23 }
 0x167   :  { %v3047_v32 = vpop.eup %3046 }
 0x168   :  { %v368_v33 = vadd.f32 1.0, %v3047_v32 }
 0x16a   :  { %3048 = vrcp.f32 %v368_v33  ;;  %v255_v33 = vadd.f32 %v2617_v63, %v3539_v25 }
 0x174   :  { %v3049_v34 = vpop.eup %3048 }
 0x175   :  { %v372_v37 = vmul.f32 0.0, %v3049_v34 }
 0x1d8   :  { %v375_v35 = vpop.permute.xlu0 %374 }
 0x1d9   :  { %v377_v36 = vmul.f32 %v3049_v34, %v375_v35 }
 0x1db   :  { %379 = vrot.lane.b32.xlu0 %v377_v36, %s3323_s23 }
 0x22d   :  { %v3600_v30 = vpop.f32.mrb[6].mxu0 }
 0x22e   :  { %v3602_v31 = vpop.f32.mrb[7].mxu0 }
 0x24d   :  { %v380_v38 = vpop.permute.xlu0 %379 }
 0x24e   :  { %v382_v39 = vadd.f32 %v380_v38, %v372_v37 }
 0x250   :  { %3050 = vtanh.f32 %v382_v39 }
 0x25a   :  { %v3051_v40 = vpop.eup %3050 }
 0x25b   :  { %385 = vrot.lane.b32.xlu1 %v3051_v40, %s3323_s23 }
 0x2cd   :  { %v386_v41 = vpop.permute.xlu1 %385 }
 0x2ce   :  { %v388_v42 = vmul.f32 %v3049_v34, %v386_v41 }
 0x2d0   :  { %390 = vrot.lane.b32.xlu1 %v388_v42, %s3324_s2 }
 0x342   :  { %v391_v43 = vpop.permute.xlu1 %390 }
 0x343   :  { %393 = vst.msk [vmem:[#allocation3] sm:$0xff] %vm291_vm2, %v391_v43  ;;  %2644 = vmatmul.mubr.msk.f32.vlgmr.msra.gmra.mrb[2].mxu1 %vm291_vm2, %v391_v43 }
 0x344   :  { %2908 = vmatpush3.bf16.msra.mxu1 %v3508_v13  ;;  %2654 = vmatprep.mubr.msk.f32.mxu1 %vm3321_vm0, %v3322_v2 }
 0x345   :  { %2909 = vmatprep.subr.bf16.mxu1 %v3320_v1 }
 0x348   :  { %2911 = vmatpush3.bf16.msra.mxu1 %v3515_v18 }
 0x349   :  { %2918 = vmatprep.subr.bf16.mxu1 %v3320_v1 }
 0x416   :  { %v463_v45 = vpop.f32.mrb[2].mxu1 }
 0x417   :  { %v464_v46 = vadd.f32 %v463_v45, %v245_v44  ;;  %v2645_v47 = vpop.f32.mrb[3].mxu1 }
 0x419   :  { %3052 = vtanh.f32 %v464_v46  ;;  %v2409_v49 = vmul.f32 -1.442695, %v464_v46 }
 0x41b   :  { %3054 = vpow2.f32 %v2409_v49 }
 0x423   :  { %v3053_v48 = vpop.eup %3052 }
 0x424   :  { %476 = vrot.lane.b32.xlu0 %v3053_v48, %s3323_s23 }
 0x425   :  { %v3055_v50 = vpop.eup %3054 }
 0x426   :  { %v470_v51 = vadd.f32 1.0, %v3055_v50 }
 0x428   :  { %3056 = vrcp.f32 %v470_v51  ;;  %v260_v51 = vadd.f32 %v3539_v25, %v259_v29  ;;  %v1119_v29 = vld [vmem:[#allocation9 + $0x18] sm:$0xff] }
 0x432   :  { %v3057_v52 = vpop.eup %3056 }
 0x433   :  { %v474_v55 = vmul.f32 %v3057_v52, %v382_v39 }
 0x496   :  { %v477_v53 = vpop.permute.xlu0 %476 }
 0x497   :  { %v479_v54 = vmul.f32 %v3057_v52, %v477_v53 }
 0x499   :  { %481 = vrot.lane.b32.xlu1 %v479_v54, %s3323_s23 }
 0x50b   :  { %v482_v56 = vpop.permute.xlu1 %481 }
 0x50c   :  { %v484_v57 = vadd.f32 %v482_v56, %v474_v55 }
 0x50e   :  { %3058 = vtanh.f32 %v484_v57 }
 0x518   :  { %v3059_v60 = vpop.eup %3058 }
 0x519   :  { %487 = vrot.lane.b32.xlu0 %v3059_v60, %s3323_s23 }
 0x58b   :  { %v488_v61 = vpop.permute.xlu0 %487 }
 0x58c   :  { %v490_v62 = vmul.f32 %v3057_v52, %v488_v61 }
 0x58e   :  { %492 = vrot.lane.b32.xlu1 %v490_v62, %s3324_s2 }
 0x600   :  { %v493_v3 = vpop.permute.xlu1 %492 }
 0x601   :  { %495 = vst.msk [vmem:[#allocation3 + $0x8] sm:$0xff] %vm291_vm2, %v493_v3  ;;  %2655 = vmatmul.mubr.msk.f32.vlgmr.msra.gmra.mrb[4].mxu1 %vm291_vm2, %v493_v3 }
 0x602   :  { %2920 = vmatpush3.bf16.msra.mxu1 %v3508_v13  ;;  %2676 = vmatprep.mubr.msk.f32.mxu1 %vm3321_vm0, %v3322_v2 }
 0x603   :  { %2921 = vmatprep.subr.bf16.mxu1 %v3320_v1 }
 0x606   :  { %2923 = vmatpush3.bf16.msra.mxu1 %v3515_v18 }
 0x607   :  { %2930 = vmatprep.subr.bf16.mxu1 %v3320_v1 }
 0x6d4   :  { %v565_v5 = vpop.f32.mrb[4].mxu1 }
 0x6d5   :  { %v566_v6 = vadd.f32 %v565_v5, %v250_v4  ;;  %v2656_v7 = vpop.f32.mrb[5].mxu1 }
 0x6d6   :  { %v265_v7 = vadd.f32 %v3598_v28, %v3539_v25  ;;  %v1118_v28 = vld [vmem:[#allocation9 + $0x10] sm:$0xff] }
 0x6d7   :  { %3060 = vtanh.f32 %v566_v6  ;;  %v2411_v9 = vmul.f32 -1.442695, %v566_v6 }
 0x6d9   :  { %3062 = vpow2.f32 %v2411_v9 }
 0x6e1   :  { %v3061_v8 = vpop.eup %3060 }
 0x6e2   :  { %578 = vrot.lane.b32.xlu0 %v3061_v8, %s3323_s23 }
 0x6e3   :  { %v3063_v10 = vpop.eup %3062 }
 0x6e4   :  { %v572_v11 = vadd.f32 1.0, %v3063_v10 }
 0x6e6   :  { %3064 = vrcp.f32 %v572_v11 }
 0x6f0   :  { %v3065_v12 = vpop.eup %3064 }
 0x6f1   :  { %v576_v16 = vmul.f32 %v3065_v12, %v484_v57 }
 0x754   :  { %v579_v14 = vpop.permute.xlu0 %578 }
 0x755   :  { %v581_v15 = vmul.f32 %v3065_v12, %v579_v14 }
 0x757   :  { %583 = vrot.lane.b32.xlu1 %v581_v15, %s3323_s23 }
 0x7c9   :  { %v584_v17 = vpop.permute.xlu1 %583 }
 0x7ca   :  { %v586_v19 = vadd.f32 %v584_v17, %v576_v16 }
 0x7cc   :  { %3066 = vtanh.f32 %v586_v19 }
 0x7d6   :  { %v3067_v24 = vpop.eup %3066 }
 0x7d7   :  { %589 = vrot.lane.b32.xlu0 %v3067_v24, %s3323_s23 }
 0x849   :  { %v590_v26 = vpop.permute.xlu0 %589 }
 0x84a   :  { %v592_v27 = vmul.f32 %v3065_v12, %v590_v26 }
 0x84c   :  { %594 = vrot.lane.b32.xlu1 %v592_v27, %s3324_s2 }
 0x8be   :  { %v595_v32 = vpop.permute.xlu1 %594 }
 0x8bf   :  { %597 = vst.msk [vmem:[#allocation3 + $0x10] sm:$0xff] %vm291_vm2, %v595_v32  ;;  %2666 = vmatmul.mubr.msk.f32.vlgmr.msra.gmra.mrb[8].mxu0 %vm291_vm2, %v595_v32  ;;  %v2946_v32 = vpack.c.bf16 %v1119_v29, %v1118_v28 }
 0x8c0   :  { %2926 = vmatpush3.bf16.msra.mxu0 %v3508_v13  ;;  %2687 = vmatprep.mubr.msk.f32.mxu0 %vm3321_vm0, %v3322_v2 }
 0x8c1   :  { %2927 = vmatprep.subr.bf16.mxu0 %v3320_v1 }
 0x8c4   :  { %2929 = vmatpush3.bf16.msra.mxu0 %v3515_v18 }
 0x8c5   :  { %2936 = vmatprep.subr.bf16.mxu0 %v3320_v1 }
 0x992   :  { %v667_v34 = vpop.f32.mrb[8].mxu0 }
 0x993   :  { %v668_v35 = vadd.f32 %v667_v34, %v255_v33  ;;  %v2667_v36 = vpop.f32.mrb[9].mxu0  ;;  %v1108_v34 = vld [vmem:[#allocation3] sm:$0xff] }
 0x994   :  { %v1110_v36 = vld [vmem:[#allocation3 + $0x10] sm:$0xff] }
 0x995   :  { %3068 = vtanh.f32 %v668_v35  ;;  %v2413_v38 = vmul.f32 -1.442695, %v668_v35  ;;  %v1109_v35 = vld [vmem:[#allocation3 + $0x8] sm:$0xff] }
 0x997   :  { %3070 = vpow2.f32 %v2413_v38 }
 0x99f   :  { %v3069_v37 = vpop.eup %3068 }
 0x9a0   :  { %680 = vrot.lane.b32.xlu0 %v3069_v37, %s3323_s23 }
 0x9a1   :  { %v3071_v39 = vpop.eup %3070 }
 0x9a2   :  { %v674_v40 = vadd.f32 1.0, %v3071_v39 }
 0x9a4   :  { %3072 = vrcp.f32 %v674_v40  ;;  %v270_v40 = vadd.f32 %v3539_v25, %v3602_v31 }
 0x9ae   :  { %v3073_v41 = vpop.eup %3072 }
 0x9af   :  { %v678_v44 = vmul.f32 %v3073_v41, %v586_v19 }
 0xa12   :  { %v681_v42 = vpop.permute.xlu0 %680 }
 0xa13   :  { %v683_v43 = vmul.f32 %v3073_v41, %v681_v42 }
 0xa15   :  { %685 = vrot.lane.b32.xlu1 %v683_v43, %s3323_s23 }
 0xa87   :  { %v686_v45 = vpop.permute.xlu1 %685 }
 0xa88   :  { %v688_v46 = vadd.f32 %v686_v45, %v678_v44 }
 0xa8a   :  { %3074 = vtanh.f32 %v688_v46 }
 0xa94   :  { %v3075_v47 = vpop.eup %3074 }
 0xa95   :  { %691 = vrot.lane.b32.xlu0 %v3075_v47, %s3323_s23 }
 0xb07   :  { %v692_v48 = vpop.permute.xlu0 %691 }
 0xb08   :  { %v694_v49 = vmul.f32 %v3073_v41, %v692_v48 }
 0xb0a   :  { %696 = vrot.lane.b32.xlu1 %v694_v49, %s3324_s2 }
 0xb7c   :  { %v697_v50 = vpop.permute.xlu1 %696 }
 0xb7d   :  { %699 = vst.msk [vmem:[#allocation3 + $0x18] sm:$0xff] %vm291_vm2, %v697_v50  ;;  %2677 = vmatmul.mubr.msk.f32.vlgmr.msra.gmra.mrb[6].mxu1 %vm291_vm2, %v697_v50 }
 0xb7e   :  { %2932 = vmatpush3.bf16.msra.mxu1 %v3508_v13  ;;  %2698 = vmatprep.mubr.msk.f32.mxu1 %vm3321_vm0, %v3322_v2 }
 0xb7f   :  { %2933 = vmatprep.subr.bf16.mxu1 %v3320_v1 }
 0xb82   :  { %2935 = vmatpush3.bf16.msra.mxu1 %v3515_v18 }
 0xb83   :  { %2943 = vmatprep.subr.bf16.mxu1 %v2942_v23 }
 0xb84   :  { %v1111_v37 = vld [vmem:[#allocation3 + $0x18] sm:$0xff] }
 0xc50   :  { %v769_v52 = vpop.f32.mrb[6].mxu1 }
 0xc51   :  { %v770_v53 = vadd.f32 %v769_v52, %v260_v51  ;;  %v2678_v54 = vpop.f32.mrb[7].mxu1 }
 0xc53   :  { %3076 = vtanh.f32 %v770_v53  ;;  %v2415_v56 = vmul.f32 -1.442695, %v770_v53 }
 0xc55   :  { %3078 = vpow2.f32 %v2415_v56 }
 0xc5d   :  { %v3077_v55 = vpop.eup %3076 }
 0xc5e   :  { %782 = vrot.lane.b32.xlu0 %v3077_v55, %s3323_s23 }
 0xc5f   :  { %v3079_v57 = vpop.eup %3078 }
 0xc60   :  { %v776_v58 = vadd.f32 1.0, %v3079_v57 }
 0xc62   :  { %3080 = vrcp.f32 %v776_v58 }
 0xc6c   :  { %v3081_v59 = vpop.eup %3080 }
 0xc6d   :  { %v780_v62 = vmul.f32 %v3081_v59, %v688_v46 }
 0xcd0   :  { %v783_v60 = vpop.permute.xlu0 %782 }
 0xcd1   :  { %v785_v61 = vmul.f32 %v3081_v59, %v783_v60  ;;  %v1257_v60 = vld [vmem:[#allocation10 + $0x8] sm:$0xff] }
 0xcd3   :  { %787 = vrot.lane.b32.xlu1 %v785_v61, %s3323_s23 }
 0xd45   :  { %v788_v63 = vpop.permute.xlu1 %787 }
 0xd46   :  { %v790_v0 = vadd.f32 %v788_v63, %v780_v62 }
 0xd48   :  { %3082 = vtanh.f32 %v790_v0 }
 0xd52   :  { %v3083_v3 = vpop.eup %3082 }
 0xd53   :  { %793 = vrot.lane.b32.xlu0 %v3083_v3, %s3323_s23  ;;  %v1258_v3 = vld [vmem:[#allocation10 + $0x10] sm:$0xff] }
 0xdc5   :  { %v794_v4 = vpop.permute.xlu0 %793 }
 0xdc6   :  { %v796_v5 = vmul.f32 %v3081_v59, %v794_v4  ;;  %v1256_v59 = vld [vmem:[#allocation10] sm:$0xff]  ;;  %v1259_v4 = vld [vmem:[#allocation10 + $0x18] sm:$0xff] }
 0xdc7   :  { %v2950_v61 = vpack.c.bf16 %v1257_v60, %v1256_v59 }
 0xdc8   :  { %798 = vrot.lane.b32.xlu1 %v796_v5, %s3324_s2  ;;  %v2954_v5 = vpack.c.bf16 %v1259_v4, %v1258_v3 }
 0xe3a   :  { %v799_v6 = vpop.permute.xlu1 %798 }
 0xe3b   :  { %801 = vst.msk [vmem:[#allocation3 + $0x20] sm:$0xff] %vm291_vm2, %v799_v6  ;;  %2688 = vmatmul.mubr.msk.f32.vlgmr.msra.gmra.mrb[10].mxu0 %vm291_vm2, %v799_v6 }
 0xe3c   :  { %2938 = vmatpush3.bf16.msra.mxu0 %v3508_v13  ;;  %2709 = vmatprep.mubr.msk.f32.mxu0 %vm3321_vm0, %v3322_v2 }
 0xe3d   :  { %2939 = vmatprep.subr.bf16.mxu0 %v3320_v1 }
 0xe40   :  { %2941 = vmatpush3.bf16.msra.mxu0 %v3515_v18 }
 0xe41   :  { %2951 = vmatprep.subr.bf16.mxu0 %v2950_v61 }
 0xe42   :  { %v1112_v38 = vld [vmem:[#allocation3 + $0x20] sm:$0xff] }
 0xf0e   :  { %v871_v8 = vpop.f32.mrb[10].mxu0 }
 0xf0f   :  { %v872_v9 = vadd.f32 %v871_v8, %v265_v7  ;;  %v2689_v10 = vpop.f32.mrb[11].mxu0  ;;  %v275_v8 = vadd.f32 %v3600_v30, %v3539_v25 }
 0xf11   :  { %3084 = vtanh.f32 %v872_v9  ;;  %v2417_v12 = vmul.f32 -1.442695, %v872_v9 }
 0xf13   :  { %3086 = vpow2.f32 %v2417_v12 }
 0xf1b   :  { %v3085_v11 = vpop.eup %3084 }
 0xf1c   :  { %884 = vrot.lane.b32.xlu0 %v3085_v11, %s3323_s23 }
 0xf1d   :  { %v3087_v13 = vpop.eup %3086 }
 0xf1e   :  { %v878_v14 = vadd.f32 1.0, %v3087_v13 }
 0xf20   :  { %3088 = vrcp.f32 %v878_v14  ;;  %v3683_v14 = vld [vmem:[%s3876_s6] ss:$0 sm:$0xff]  ;;  %s3325_s6 = smov 96  }
 0xf2a   :  { %v3089_v15 = vpop.eup %3088 }
 0xf2b   :  { %v882_v18 = vmul.f32 %v3089_v15, %v790_v0 }
 0xf8e   :  { %v885_v16 = vpop.permute.xlu0 %884 }
 0xf8f   :  { %v887_v17 = vmul.f32 %v3089_v15, %v885_v16 }
 0xf91   :  { %889 = vrot.lane.b32.xlu1 %v887_v17, %s3323_s23 }
0x1003   :  { %v890_v19 = vpop.permute.xlu1 %889 }
0x1004   :  { %v892_v20 = vadd.f32 %v890_v19, %v882_v18 }
0x1006   :  { %3090 = vtanh.f32 %v892_v20 }
0x1010   :  { %v3091_v24 = vpop.eup %3090 }
0x1011   :  { %895 = vrot.lane.b32.xlu0 %v3091_v24, %s3323_s23 }
0x1083   :  { %v896_v26 = vpop.permute.xlu0 %895 }
0x1084   :  { %v898_v27 = vmul.f32 %v3089_v15, %v896_v26 }
0x1086   :  { %900 = vrot.lane.b32.xlu1 %v898_v27, %s3324_s2 }
0x10f8   :  { %v901_v33 = vpop.permute.xlu1 %900 }
0x10f9   :  { %903 = vst.msk [vmem:[#allocation3 + $0x28] sm:$0xff] %vm291_vm2, %v901_v33  ;;  %2699 = vmatmul.mubr.msk.f32.vlgmr.msra.gmra.mrb[8].mxu1 %vm291_vm2, %v901_v33 }
0x10fa   :  { %2945 = vmatpush3.bf16.msra.mxu1 %v2942_v23  ;;  %2720 = vmatprep.mubr.msk.f32.mxu1 %vm291_vm2, %v1108_v34 }
0x10fb   :  { %2947 = vmatprep.subr.bf16.mxu1 %v2946_v32 }
0x10fe   :  { %2949 = vmatpush3.bf16.msra.mxu1 %v2946_v32 }
0x10ff   :  { %2958 = vmatprep.subr.bf16.mxu1 %v3320_v1 }
0x1100   :  { %v1113_v39 = vld [vmem:[#allocation3 + $0x28] sm:$0xff] }
0x1101   :  { %2721 = vmatmul.mubr.msk.f32.vlgmr.msra.gmra.mrb[10].mxu1 %vm291_vm2, %v1109_v35 }
0x1102   :  { %2723 = vmatprep.mubr.msk.f32.mxu1 %vm291_vm2, %v1110_v36 }
0x1105   :  { %2724 = vmatmul.mubr.msk.f32.gmra.mrb[12].mxu1 %vm291_vm2, %v1111_v37 }
0x1106   :  { %2726 = vmatprep.mubr.msk.f32.mxu1 %vm291_vm2, %v1112_v38 }
0x1109   :  { %2727 = vmatmul.mubr.msk.f32.gmra.mrb[14].mxu1 %vm291_vm2, %v1113_v39 }
0x11cc   :  { %v973_v41 = vpop.f32.mrb[8].mxu1 }
0x11cd   :  { %v974_v42 = vadd.f32 %v973_v41, %v270_v40  ;;  %v2700_v43 = vpop.f32.mrb[9].mxu1 }
0x11ce   :  { %v1384_v43 = vld [vmem:[#allocation12 + $0x18] sm:$0xff] }
0x11cf   :  { %3092 = vtanh.f32 %v974_v42  ;;  %v2419_v51 = vmul.f32 -1.442695, %v974_v42  ;;  %v1383_v42 = vld [vmem:[#allocation12 + $0x10] sm:$0xff] }
0x11d1   :  { %3094 = vpow2.f32 %v2419_v51 }
0x11d4   :  { %v3653_v44 = vpop.f32.mrb[10].mxu1 }
0x11d5   :  { %v3655_v45 = vpop.f32.mrb[11].mxu1 }
0x11d6   :  { %v1218_v51 = vadd.f32 %v3683_v14, %v3655_v45 }
0x11d8   :  { %v3657_v46 = vpop.f32.mrb[12].mxu1 }
0x11d9   :  { %v3093_v47 = vpop.eup %3092  ;;  %v1227_v48 = vpop.f32.mrb[13].mxu1  ;;  %v1233_v21 = vadd.f32 %v3657_v46, %v3683_v14  ;;  %v3707_v46 = vpack.c.bf16 %v1384_v43, %v1383_v42 }
0x11da   :  { %986 = vrot.lane.b32.xlu0 %v3093_v47, %s3323_s23 }
0x11db   :  { %v3095_v52 = vpop.eup %3094 }
0x11dc   :  { %v2728_v49 = vpop.f32.mrb[14].mxu1  ;;  %v980_v31 = vadd.f32 1.0, %v3095_v52  ;;  %v1223_v52 = vadd.f32 %v3653_v44, %v3683_v14 }
0x11dd   :  { %v1237_v50 = vpop.f32.mrb[15].mxu1  ;;  %v1243_v16 = vadd.f32 %v2728_v49, %v3683_v14 }
0x11de   :  { %3096 = vrcp.f32 %v980_v31  ;;  %v1238_v15 = vadd.f32 %v3683_v14, %v1237_v50 }
0x11e8   :  { %v3097_v53 = vpop.eup %3096 }
0x11e9   :  { %v984_v56 = vmul.f32 %v3097_v53, %v892_v20  ;;  %v1228_v20 = vadd.f32 %v3683_v14, %v1227_v48 }
0x124c   :  { %v987_v54 = vpop.permute.xlu0 %986 }
0x124d   :  { %v989_v55 = vmul.f32 %v3097_v53, %v987_v54 }
0x124f   :  { %991 = vrot.lane.b32.xlu1 %v989_v55, %s3323_s23 }
0x12c1   :  { %v992_v57 = vpop.permute.xlu1 %991 }
0x12c2   :  { %v994_v58 = vadd.f32 %v992_v57, %v984_v56 }
0x12c4   :  { %3098 = vtanh.f32 %v994_v58 }
0x12ce   :  { %v3099_v62 = vpop.eup %3098 }
0x12cf   :  { %997 = vrot.lane.b32.xlu0 %v3099_v62, %s3323_s23 }
0x1341   :  { %v998_v63 = vpop.permute.xlu0 %997 }
0x1342   :  { %v1000_v0 = vmul.f32 %v3097_v53, %v998_v63 }
0x1344   :  { %1002 = vrot.lane.b32.xlu1 %v1000_v0, %s3324_s2 }
0x13b6   :  { %v1003_v6 = vpop.permute.xlu1 %1002 }
0x13b7   :  { %1005 = vst.msk [vmem:[#allocation3 + $0x30] sm:$0xff] %vm291_vm2, %v1003_v6  ;;  %2710 = vmatmul.mubr.msk.f32.vlgmr.msra.gmra.mrb[12].mxu0 %vm291_vm2, %v1003_v6 }
0x13b8   :  { %2953 = vmatpush3.bf16.msra.mxu0 %v2950_v61  ;;  %2740 = vmatprep.mubr.msk.f32.mxu0 %vm291_vm2, %v1108_v34 }
0x13b9   :  { %2955 = vmatprep.subr.bf16.mxu0 %v2954_v5 }
0x13bc   :  { %2957 = vmatpush3.bf16.msra.mxu0 %v2954_v5 }
0x13bd   :  { %2964 = vmatprep.subr.bf16.mxu0 %v3320_v1 }
0x13be   :  { %v1114_v7 = vld [vmem:[#allocation3 + $0x30] sm:$0xff] }
0x13bf   :  { %2741 = vmatmul.mubr.msk.f32.vlgmr.msra.gmra.mrb[14].mxu0 %vm291_vm2, %v1109_v35  ;;  %2729 = vmatprep.mubr.msk.f32.mxu1 %vm291_vm2, %v1114_v7 }
0x13c0   :  { %2743 = vmatprep.mubr.msk.f32.mxu0 %vm291_vm2, %v1110_v36 }
0x13c3   :  { %2744 = vmatmul.mubr.msk.f32.gmra.mrb[16].mxu0 %vm291_vm2, %v1111_v37 }
0x13c4   :  { %2746 = vmatprep.mubr.msk.f32.mxu0 %vm291_vm2, %v1112_v38  ;;  %v1381_v38 = vld [vmem:[#allocation12] sm:$0xff] }
0x13c7   :  { %2747 = vmatmul.mubr.msk.f32.gmra.mrb[18].mxu0 %vm291_vm2, %v1113_v39  ;;  %v1382_v39 = vld [vmem:[#allocation12 + $0x8] sm:$0xff] }
0x13c8   :  { %2749 = vmatprep.mubr.msk.f32.mxu0 %vm291_vm2, %v1114_v7  ;;  %v3700_v40 = vpack.c.bf16 %v1382_v39, %v1381_v38 }
0x13ca   :  { %2960 = vmatpush3.bf16.msra.mxu1 %v3700_v40  ;;  %2966 = vmatpush3.bf16.msra.mxu0 %v3700_v40 }
0x13cb   :  { %2961 = vmatprep.subr.bf16.mxu1 %v3320_v1  ;;  %2967 = vmatprep.subr.bf16.mxu0 %v3320_v1 }
0x13ce   :  { %2963 = vmatpush3.bf16.msra.mxu1 %v3707_v46  ;;  %2969 = vmatpush3.bf16.msra.mxu0 %v3707_v46 }
0x13cf   :  { %2970 = vmatprep.subr.bf16.mxu1 %v3320_v1  ;;  %2976 = vmatprep.subr.bf16.mxu0 %v3320_v1 }
0x148a   :  { %v1075_v9 = vpop.f32.mrb[12].mxu0 }
0x148b   :  { %v1076_v10 = vadd.f32 %v1075_v9, %v275_v8  ;;  %v2711_v11 = vpop.f32.mrb[13].mxu0 }
0x148d   :  { %3100 = vtanh.f32 %v1076_v10  ;;  %v2421_v27 = vmul.f32 -1.442695, %v1076_v10 }
0x148f   :  { %3102 = vpow2.f32 %v2421_v27 }
0x1492   :  { %v3676_v12 = vpop.f32.mrb[14].mxu0 }
0x1493   :  { %v3678_v13 = vpop.f32.mrb[15].mxu0 }
0x1496   :  { %v2745_v17 = vpop.f32.mrb[16].mxu0 }
0x1497   :  { %v3101_v18 = vpop.eup %3100  ;;  %v3687_v25 = vadd.f32 %v2745_v17, %v1238_v15  ;;  %v1336_v30 = vpop.f32.mrb[17].mxu0 }
0x1498   :  { %v3689_v19 = vadd.f32 %v1336_v30, %v1243_v16  ;;  %1088 = vrot.lane.b32.xlu0 %v3101_v18, %s3323_s23 }
0x1499   :  { %v3103_v28 = vpop.eup %3102 }
0x149a   :  { %v2748_v22 = vpop.f32.mrb[18].mxu0  ;;  %v1082_v29 = vadd.f32 1.0, %v3103_v28 }
0x149b   :  { %v3695_v23 = vadd.f32 %v2748_v22, %v1228_v20  ;;  %v1346_v24 = vpop.f32.mrb[19].mxu0 }
0x149c   :  { %v3697_v26 = vadd.f32 %v1346_v24, %v1233_v21  ;;  %3104 = vrcp.f32 %v1082_v29 }
0x14a6   :  { %v3105_v32 = vpop.eup %3104 }
0x14a7   :  { %v1086_v35 = vmul.f32 %v3105_v32, %v994_v58 }
0x150a   :  { %v1089_v33 = vpop.permute.xlu0 %1088 }
0x150b   :  { %v1091_v34 = vmul.f32 %v3105_v32, %v1089_v33 }
0x150d   :  { %1093 = vrot.lane.b32.xlu1 %v1091_v34, %s3323_s23 }
0x157f   :  { %v1094_v36 = vpop.permute.xlu1 %1093 }
0x1580   :  { %v1096_v37 = vadd.f32 %v1094_v36, %v1086_v35 }
0x1582   :  { %3106 = vtanh.f32 %v1096_v37 }
0x158c   :  { %v3107_v41 = vpop.eup %3106 }
0x158d   :  { %1099 = vrot.lane.b32.xlu0 %v3107_v41, %s3323_s23 }
0x15ff   :  { %v1100_v47 = vpop.permute.xlu0 %1099 }
0x1600   :  { %v1102_v48 = vmul.f32 %v3105_v32, %v1100_v47 }
0x1602   :  { %1104 = vrot.lane.b32.xlu1 %v1102_v48, %s3324_s2 }
0x1674   :  { %v1105_v49 = vpop.permute.xlu1 %1104 }
0x1675   :  { %1107 = vst.msk [vmem:[#allocation3 + $0x38] sm:$0xff] %vm291_vm2, %v1105_v49 }
0x167c   :  { %v1115_v50 = vld [vmem:[#allocation3 + $0x38] sm:$0xff] }
0x167d   :  { %2730 = vmatmul.mubr.msk.f32.gmra.mrb[16].mxu1 %vm291_vm2, %v1115_v50  ;;  %2750 = vmatmul.mubr.msk.f32.gmra.mrb[20].mxu0 %vm291_vm2, %v1115_v50 }
0x167e   :  { %2760 = vmatprep.mubr.msk.f32.mxu1 %vm3321_vm0, %v3322_v2  ;;  %2771 = vmatprep.mubr.msk.f32.mxu0 %vm3321_vm0, %v3322_v2 }
0x1681   :  { %2761 = vmatmul.mubr.f32.vlgmr.msra.gmra.mrb[18].mxu1 %v3322_v2 }
0x1682   :  { %2972 = vmatpush3.bf16.msra.mxu1 %v3700_v40  ;;  %2782 = vmatprep.mubr.msk.f32.mxu1 %vm3321_vm0, %v3322_v2 }
0x1683   :  { %2973 = vmatprep.subr.bf16.mxu1 %v3320_v1 }
0x1686   :  { %2975 = vmatpush3.bf16.msra.mxu1 %v3707_v46 }
0x1687   :  { %2982 = vmatprep.subr.bf16.mxu1 %v3320_v1 }
0x1750   :  { %v2731_v31 = vpop.f32.mrb[16].mxu1  ;;  %v2751_v53 = vpop.f32.mrb[20].mxu0 }
0x1751   :  { %v1253_v54 = vadd.f32 %v2731_v31, %v3683_v14  ;;  %v1365_v55 = vadd.f32 %v2751_v53, %v1218_v51  ;;  %v1247_v56 = vpop.f32.mrb[17].mxu1  ;;  %v1356_v57 = vpop.f32.mrb[21].mxu0 }
0x1752   :  { %v1248_v58 = vadd.f32 %v3683_v14, %v1247_v56  ;;  %v1367_v59 = vadd.f32 %v1356_v57, %v1223_v52 }
0x1753   :  { %v3735_v60 = vadd.f32 %v3678_v13, %v1253_v54 }
0x1754   :  { %v1452_v61 = vpop.f32.mrb[18].mxu1  ;;  %v3738_v62 = vadd.f32 %v3676_v12, %v1248_v58 }
0x1755   :  { %v1453_v45 = vadd.f32 %v1452_v61, %v1365_v55  ;;  %v2762_v63 = vpop.f32.mrb[19].mxu1 }
0x1757   :  { %3108 = vtanh.f32 %v1453_v45  ;;  %v2439_v0 = vmul.f32 -1.442695, %v1453_v45 }
0x1759   :  { %3110 = vpow2.f32 %v2439_v0 }
0x1761   :  { %v3109_v44 = vpop.eup %3108 }
0x1762   :  { %1465 = vrot.lane.b32.xlu0 %v3109_v44, %s3323_s23 }
0x1763   :  { %v3111_v3 = vpop.eup %3110 }
0x1764   :  { %v1459_v4 = vadd.f32 1.0, %v3111_v3 }
0x1766   :  { %3112 = vrcp.f32 %v1459_v4 }
0x1770   :  { %v3113_v5 = vpop.eup %3112 }
0x1771   :  { %v1463_v8 = vmul.f32 0.0, %v3113_v5 }
0x17d4   :  { %v1466_v6 = vpop.permute.xlu0 %1465 }
0x17d5   :  { %v1468_v7 = vmul.f32 %v3113_v5, %v1466_v6 }
0x17d7   :  { %1470 = vrot.lane.b32.xlu1 %v1468_v7, %s3323_s23 }
0x1849   :  { %v1471_v9 = vpop.permute.xlu1 %1470 }
0x184a   :  { %v1473_v10 = vadd.f32 %v1471_v9, %v1463_v8 }
0x184c   :  { %3114 = vtanh.f32 %v1473_v10 }
0x1856   :  { %v3115_v11 = vpop.eup %3114 }
0x1857   :  { %1476 = vrot.lane.b32.xlu0 %v3115_v11, %s3323_s23 }
0x18c9   :  { %v1477_v12 = vpop.permute.xlu0 %1476 }
0x18ca   :  { %v3743_v13 = vmul.f32 %v3113_v5, %v1477_v12 }
0x18cc   :  { %1483 = vrot.lane.b32.xlu1 %v3743_v13, %s3324_s2 }
0x193e   :  { %v1484_v14 = vpop.permute.xlu1 %1483 }
0x193f   :  { %2772 = vmatmul.mubr.msk.f32.vlgmr.msra.gmra.mrb[22].mxu0 %vm291_vm2, %v1484_v14 }
0x1940   :  { %2978 = vmatpush3.bf16.msra.mxu0 %v3700_v40  ;;  %2793 = vmatprep.mubr.msk.f32.mxu0 %vm3321_vm0, %v3322_v2 }
0x1941   :  { %2979 = vmatprep.subr.bf16.mxu0 %v3320_v1 }
0x1944   :  { %2981 = vmatpush3.bf16.msra.mxu0 %v3707_v46 }
0x1945   :  { %2988 = vmatprep.subr.bf16.mxu0 %v3320_v1 }
0x1a12   :  { %v1553_v15 = vpop.f32.mrb[22].mxu0 }
0x1a13   :  { %v1554_v16 = vadd.f32 %v1553_v15, %v1367_v59  ;;  %v2773_v17 = vpop.f32.mrb[23].mxu0 }
0x1a15   :  { %3116 = vtanh.f32 %v1554_v16  ;;  %v2441_v30 = vmul.f32 -1.442695, %v1554_v16 }
0x1a17   :  { %3118 = vpow2.f32 %v2441_v30 }
0x1a1f   :  { %v3117_v18 = vpop.eup %3116 }
0x1a20   :  { %1566 = vrot.lane.b32.xlu0 %v3117_v18, %s3323_s23 }
0x1a21   :  { %v3119_v20 = vpop.eup %3118 }
0x1a22   :  { %v1560_v21 = vadd.f32 1.0, %v3119_v20 }
0x1a24   :  { %3120 = vrcp.f32 %v1560_v21 }
0x1a2e   :  { %v3121_v22 = vpop.eup %3120 }
0x1a2f   :  { %v1564_v28 = vmul.f32 %v3121_v22, %v1473_v10 }
0x1a92   :  { %v1567_v24 = vpop.permute.xlu0 %1566 }
0x1a93   :  { %v1569_v27 = vmul.f32 %v3121_v22, %v1567_v24 }
0x1a95   :  { %1571 = vrot.lane.b32.xlu1 %v1569_v27, %s3323_s23 }
0x1b07   :  { %v1572_v29 = vpop.permute.xlu1 %1571 }
0x1b08   :  { %v1574_v32 = vadd.f32 %v1572_v29, %v1564_v28 }
0x1b0a   :  { %3122 = vtanh.f32 %v1574_v32 }
0x1b14   :  { %v3123_v33 = vpop.eup %3122 }
0x1b15   :  { %1577 = vrot.lane.b32.xlu0 %v3123_v33, %s3323_s23 }
0x1b87   :  { %v1578_v34 = vpop.permute.xlu0 %1577 }
0x1b88   :  { %v1580_v35 = vmul.f32 %v3121_v22, %v1578_v34 }
0x1b8a   :  { %1585 = vrot.lane.b32.xlu1 %v1580_v35, %s3324_s2  ;;  %v1581_v54 = vadd.f32 %v1580_v35, %v3743_v13  ;;  %v1582_v55 = vmax.f32 %v3743_v13, %v1580_v35 }
0x1bfc   :  { %v1586_v36 = vpop.permute.xlu1 %1585 }
0x1bfd   :  { %2783 = vmatmul.mubr.msk.f32.vlgmr.msra.gmra.mrb[20].mxu1 %vm291_vm2, %v1586_v36 }
0x1bfe   :  { %2984 = vmatpush3.bf16.msra.mxu1 %v3700_v40  ;;  %2804 = vmatprep.mubr.msk.f32.mxu1 %vm3321_vm0, %v3322_v2 }
0x1bff   :  { %2985 = vmatprep.subr.bf16.mxu1 %v3320_v1 }
0x1c02   :  { %2987 = vmatpush3.bf16.msra.mxu1 %v3707_v46 }
0x1c03   :  { %2994 = vmatprep.subr.bf16.mxu1 %v3320_v1 }
0x1cd0   :  { %v1655_v37 = vpop.f32.mrb[20].mxu1 }
0x1cd1   :  { %v1656_v38 = vadd.f32 %v1655_v37, %v3695_v23  ;;  %v2784_v39 = vpop.f32.mrb[21].mxu1 }
0x1cd3   :  { %3124 = vtanh.f32 %v1656_v38  ;;  %v2443_v42 = vmul.f32 -1.442695, %v1656_v38 }
0x1cd5   :  { %3126 = vpow2.f32 %v2443_v42 }
0x1cdd   :  { %v3125_v41 = vpop.eup %3124 }
0x1cde   :  { %1668 = vrot.lane.b32.xlu0 %v3125_v41, %s3323_s23 }
0x1cdf   :  { %v3127_v43 = vpop.eup %3126 }
0x1ce0   :  { %v1662_v47 = vadd.f32 1.0, %v3127_v43 }
0x1ce2   :  { %3128 = vrcp.f32 %v1662_v47 }
0x1cec   :  { %v3129_v48 = vpop.eup %3128 }
0x1ced   :  { %v1666_v51 = vmul.f32 %v3129_v48, %v1574_v32 }
0x1d50   :  { %v1669_v49 = vpop.permute.xlu0 %1668 }
0x1d51   :  { %v1671_v50 = vmul.f32 %v3129_v48, %v1669_v49 }
0x1d53   :  { %1673 = vrot.lane.b32.xlu1 %v1671_v50, %s3323_s23 }
0x1dc5   :  { %v1674_v52 = vpop.permute.xlu1 %1673 }
0x1dc6   :  { %v1676_v31 = vadd.f32 %v1674_v52, %v1666_v51 }
0x1dc8   :  { %3130 = vtanh.f32 %v1676_v31 }
0x1dd2   :  { %v3131_v23 = vpop.eup %3130 }
0x1dd3   :  { %1679 = vrot.lane.b32.xlu0 %v3131_v23, %s3323_s23 }
0x1e45   :  { %v1680_v53 = vpop.permute.xlu0 %1679 }
0x1e46   :  { %v1682_v56 = vmul.f32 %v3129_v48, %v1680_v53 }
0x1e48   :  { %v1683_v57 = vadd.f32 %v1682_v56, %v1581_v54  ;;  %v3771_v58 = vmax.f32 %v1582_v55, %v1682_v56  ;;  %1687 = vrot.lane.b32.xlu1 %v1682_v56, %s3324_s2 }
0x1eba   :  { %v1688_v59 = vpop.permute.xlu1 %1687 }
0x1ebb   :  { %2794 = vmatmul.mubr.msk.f32.vlgmr.msra.gmra.mrb[24].mxu0 %vm291_vm2, %v1688_v59 }
0x1ebc   :  { %2990 = vmatpush3.bf16.msra.mxu0 %v3700_v40  ;;  %2815 = vmatprep.mubr.msk.f32.mxu0 %vm3321_vm0, %v3322_v2 }
0x1ebd   :  { %2991 = vmatprep.subr.bf16.mxu0 %v3320_v1 }
0x1ec0   :  { %2993 = vmatpush3.bf16.msra.mxu0 %v3707_v46 }
0x1ec1   :  { %3000 = vmatprep.subr.bf16.mxu0 %v3320_v1 }
0x1f8e   :  { %v1757_v61 = vpop.f32.mrb[24].mxu0 }
0x1f8f   :  { %v1758_v45 = vadd.f32 %v1757_v61, %v3697_v26  ;;  %v2795_v63 = vpop.f32.mrb[25].mxu0 }
0x1f91   :  { %3132 = vtanh.f32 %v1758_v45  ;;  %v2445_v0 = vmul.f32 -1.442695, %v1758_v45 }
0x1f93   :  { %3134 = vpow2.f32 %v2445_v0 }
0x1f9b   :  { %v3133_v44 = vpop.eup %3132 }
0x1f9c   :  { %1770 = vrot.lane.b32.xlu0 %v3133_v44, %s3323_s23 }
0x1f9d   :  { %v3135_v3 = vpop.eup %3134 }
0x1f9e   :  { %v1764_v4 = vadd.f32 1.0, %v3135_v3 }
0x1fa0   :  { %3136 = vrcp.f32 %v1764_v4 }
0x1faa   :  { %v3137_v5 = vpop.eup %3136 }
0x1fab   :  { %v1768_v8 = vmul.f32 %v3137_v5, %v1676_v31 }
0x200e   :  { %v1771_v6 = vpop.permute.xlu0 %1770 }
0x200f   :  { %v1773_v7 = vmul.f32 %v3137_v5, %v1771_v6 }
0x2011   :  { %1775 = vrot.lane.b32.xlu1 %v1773_v7, %s3323_s23 }
0x2083   :  { %v1776_v9 = vpop.permute.xlu1 %1775 }
0x2084   :  { %v1778_v10 = vadd.f32 %v1776_v9, %v1768_v8 }
0x2086   :  { %3138 = vtanh.f32 %v1778_v10 }
0x2090   :  { %v3139_v26 = vpop.eup %3138 }
0x2091   :  { %1781 = vrot.lane.b32.xlu0 %v3139_v26, %s3323_s23 }
0x2103   :  { %v1782_v11 = vpop.permute.xlu0 %1781 }
0x2104   :  { %v1784_v12 = vmul.f32 %v3137_v5, %v1782_v11 }
0x2106   :  { %v1785_v13 = vadd.f32 %v1784_v12, %v1683_v57  ;;  %v1786_v14 = vmax.f32 %v3771_v58, %v1784_v12  ;;  %1789 = vrot.lane.b32.xlu1 %v1784_v12, %s3324_s2 }
0x2178   :  { %v1790_v15 = vpop.permute.xlu1 %1789 }
0x2179   :  { %2805 = vmatmul.mubr.msk.f32.vlgmr.msra.gmra.mrb[22].mxu1 %vm291_vm2, %v1790_v15 }
0x217a   :  { %2996 = vmatpush3.bf16.msra.mxu1 %v3700_v40  ;;  %2826 = vmatprep.mubr.msk.f32.mxu1 %vm3321_vm0, %v3322_v2 }
0x217b   :  { %2997 = vmatprep.subr.bf16.mxu1 %v3320_v1 }
0x217e   :  { %2999 = vmatpush3.bf16.msra.mxu1 %v3707_v46 }
0x217f   :  { %3006 = vmatprep.subr.bf16.mxu1 %v3320_v1 }
0x224c   :  { %v1859_v16 = vpop.f32.mrb[22].mxu1 }
0x224d   :  { %v1860_v17 = vadd.f32 %v1859_v16, %v3687_v25  ;;  %v2806_v18 = vpop.f32.mrb[23].mxu1 }
0x224f   :  { %3140 = vtanh.f32 %v1860_v17  ;;  %v2447_v20 = vmul.f32 -1.442695, %v1860_v17 }
0x2251   :  { %3142 = vpow2.f32 %v2447_v20 }
0x2259   :  { %v3141_v30 = vpop.eup %3140 }
0x225a   :  { %1872 = vrot.lane.b32.xlu0 %v3141_v30, %s3323_s23 }
0x225b   :  { %v3143_v21 = vpop.eup %3142 }
0x225c   :  { %v1866_v22 = vadd.f32 1.0, %v3143_v21 }
0x225e   :  { %3144 = vrcp.f32 %v1866_v22 }
0x2268   :  { %v3145_v24 = vpop.eup %3144 }
0x2269   :  { %v1870_v29 = vmul.f32 %v3145_v24, %v1778_v10 }
0x22cc   :  { %v1873_v27 = vpop.permute.xlu0 %1872 }
0x22cd   :  { %v1875_v28 = vmul.f32 %v3145_v24, %v1873_v27  ;;  %v2206_v27 = vld [vmem:[#allocation13 + $0x8] sm:$0xff] }
0x22cf   :  { %1877 = vrot.lane.b32.xlu1 %v1875_v28, %s3323_s23  ;;  %v2207_v28 = vld [vmem:[#allocation13 + $0x10] sm:$0xff] }
0x2341   :  { %v1878_v32 = vpop.permute.xlu1 %1877 }
0x2342   :  { %v1880_v33 = vadd.f32 %v1878_v32, %v1870_v29  ;;  %v2208_v32 = vld [vmem:[#allocation13 + $0x18] sm:$0xff] }
0x2344   :  { %3146 = vtanh.f32 %v1880_v33 }
0x234e   :  { %v3147_v25 = vpop.eup %3146 }
0x234f   :  { %1883 = vrot.lane.b32.xlu0 %v3147_v25, %s3323_s23  ;;  %v2209_v25 = vld [vmem:[#allocation13 + $0x20] sm:$0xff] }
0x23c1   :  { %v1884_v34 = vpop.permute.xlu0 %1883 }
0x23c2   :  { %v1886_v35 = vmul.f32 %v3145_v24, %v1884_v34  ;;  %v2210_v34 = vld [vmem:[#allocation13 + $0x28] sm:$0xff] }
0x23c4   :  { %v1887_v36 = vadd.f32 %v1886_v35, %v1785_v13  ;;  %v3798_v37 = vmax.f32 %v1786_v14, %v1886_v35  ;;  %1891 = vrot.lane.b32.xlu1 %v1886_v35, %s3324_s2 }
0x2436   :  { %v1892_v38 = vpop.permute.xlu1 %1891 }
0x2437   :  { %2816 = vmatmul.mubr.msk.f32.vlgmr.msra.gmra.mrb[26].mxu0 %vm291_vm2, %v1892_v38  ;;  %v2212_v38 = vld [vmem:[#allocation13 + $0x38] sm:$0xff] }
0x2438   :  { %3002 = vmatpush3.bf16.msra.mxu0 %v3700_v40  ;;  %2837 = vmatprep.mubr.msk.f32.mxu0 %vm3321_vm0, %v3322_v2 }
0x2439   :  { %3003 = vmatprep.subr.bf16.mxu0 %v3320_v1 }
0x243c   :  { %3005 = vmatpush3.bf16.msra.mxu0 %v3707_v46 }
0x243d   :  { %3018 = vmatprep.subr.bf16.mxu0 %v3320_v1 }
0x250a   :  { %v1961_v39 = vpop.f32.mrb[26].mxu0 }
0x250b   :  { %v1962_v41 = vadd.f32 %v1961_v39, %v3689_v19  ;;  %v2817_v42 = vpop.f32.mrb[27].mxu0 }
0x250d   :  { %3148 = vtanh.f32 %v1962_v41  ;;  %v2449_v47 = vmul.f32 -1.442695, %v1962_v41 }
0x250f   :  { %3150 = vpow2.f32 %v2449_v47 }
0x2517   :  { %v3149_v43 = vpop.eup %3148 }
0x2518   :  { %1974 = vrot.lane.b32.xlu0 %v3149_v43, %s3323_s23 }
0x2519   :  { %v3151_v40 = vpop.eup %3150 }
0x251a   :  { %v1968_v48 = vadd.f32 1.0, %v3151_v40 }
0x251c   :  { %3152 = vrcp.f32 %v1968_v48 }
0x2526   :  { %v3153_v49 = vpop.eup %3152 }
0x2527   :  { %v1972_v46 = vmul.f32 %v3153_v49, %v1880_v33  ;;  %v3010_v33 = vpack.c.bf16 %v2208_v32, %v2207_v28 }
0x258a   :  { %v1975_v50 = vpop.permute.xlu0 %1974 }
0x258b   :  { %v1977_v51 = vmul.f32 %v3153_v49, %v1975_v50 }
0x258d   :  { %1979 = vrot.lane.b32.xlu1 %v1977_v51, %s3323_s23  ;;  %v2300_v51 = vld [vmem:[%s3880_s10] sm:$0xff] }
0x25ff   :  { %v1980_v52 = vpop.permute.xlu1 %1979 }
0x2600   :  { %v1982_v31 = vadd.f32 %v1980_v52, %v1972_v46  ;;  %v2301_v46 = vld [vmem:[%s3880_s10 + $0x8] sm:$0xff]  ;;  %v2302_v52 = vld [vmem:[%s3880_s10 + $0x10] sm:$0xff] }
0x2602   :  { %3154 = vtanh.f32 %v1982_v31 }
0x260c   :  { %v3155_v19 = vpop.eup %3154 }
0x260d   :  { %1985 = vrot.lane.b32.xlu0 %v3155_v19, %s3323_s23  ;;  %v2303_v19 = vld [vmem:[%s3880_s10 + $0x18] sm:$0xff] }
0x267f   :  { %v1986_v23 = vpop.permute.xlu0 %1985 }
0x2680   :  { %v1988_v53 = vmul.f32 %v3153_v49, %v1986_v23  ;;  %v3022_v23 = vpack.c.bf16 %v2303_v19, %v2302_v52 }
0x2682   :  { %v1989_v54 = vadd.f32 %v1988_v53, %v1887_v36  ;;  %v1990_v55 = vmax.f32 %v3798_v37, %v1988_v53  ;;  %1993 = vrot.lane.b32.xlu1 %v1988_v53, %s3324_s2  ;;  %v3013_v36 = vpack.c.bf16 %v2210_v34, %v2209_v25  ;;  %v2211_v37 = vld [vmem:[#allocation13 + $0x30] sm:$0xff]  ;;  %v2304_v53 = vld [vmem:[%s3880_s10 + $0x20] sm:$0xff] }
0x2683   :  { %v3016_v39 = vpack.c.bf16 %v2212_v38, %v2211_v37 }
0x26f4   :  { %v1994_v56 = vpop.permute.xlu1 %1993 }
0x26f5   :  { %2827 = vmatmul.mubr.msk.f32.vlgmr.msra.gmra.mrb[24].mxu1 %vm291_vm2, %v1994_v56  ;;  %v2306_v56 = vld [vmem:[%s3880_s10 + $0x30] sm:$0xff] }
0x26f6   :  { %2856 = vmatprep.mubr.msk.f32.mxu1 %vm3321_vm0, %v3322_v2 }
0x27c8   :  { %v2063_v57 = vpop.f32.mrb[24].mxu1 }
0x27c9   :  { %v2064_v58 = vadd.f32 %v2063_v57, %v3738_v62  ;;  %v2828_v59 = vpop.f32.mrb[25].mxu1  ;;  %v2307_v57 = vld [vmem:[%s3880_s10 + $0x38] sm:$0xff] }
0x27ca   :  { %v2454_v59 = vld [vmem:[%s3879_s9] ss:$0 sm:$0xff] }
0x27cb   :  { %3156 = vtanh.f32 %v2064_v58  ;;  %v2451_v45 = vmul.f32 -1.442695, %v2064_v58  ;;  %v3028_v58 = vpack.c.bf16 %v2307_v57, %v2306_v56 }
0x27cd   :  { %3158 = vpow2.f32 %v2451_v45 }
0x27d5   :  { %v3157_v61 = vpop.eup %3156 }
0x27d6   :  { %2076 = vrot.lane.b32.xlu0 %v3157_v61, %s3323_s23 }
0x27d7   :  { %v3159_v63 = vpop.eup %3158 }
0x27d8   :  { %v2070_v44 = vadd.f32 1.0, %v3159_v63 }
0x27da   :  { %3160 = vrcp.f32 %v2070_v44 }
0x27e4   :  { %v3161_v0 = vpop.eup %3160 }
0x27e5   :  { %v2074_v5 = vmul.f32 %v3161_v0, %v1982_v31  ;;  %v3019_v31 = vpack.c.bf16 %v2301_v46, %v2300_v51 }
0x2848   :  { %v2077_v3 = vpop.permute.xlu0 %2076 }
0x2849   :  { %v2079_v4 = vmul.f32 %v3161_v0, %v2077_v3 }
0x284b   :  { %2081 = vrot.lane.b32.xlu1 %v2079_v4, %s3323_s23 }
0x28bd   :  { %v2082_v6 = vpop.permute.xlu1 %2081 }
0x28be   :  { %v2084_v7 = vadd.f32 %v2082_v6, %v2074_v5  ;;  %v2456_v5 = vld [vmem:[#allocation4] ss:$0 sm:$0xff] }
0x28c0   :  { %3162 = vtanh.f32 %v2084_v7 }
0x28ca   :  { %v3163_v62 = vpop.eup %3162 }
0x28cb   :  { %2087 = vrot.lane.b32.xlu0 %v3163_v62, %s3323_s23 }
0x293d   :  { %v2088_v8 = vpop.permute.xlu0 %2087 }
0x293e   :  { %v2090_v9 = vmul.f32 %v3161_v0, %v2088_v8 }
0x2940   :  { %2095 = vrot.lane.b32.xlu1 %v2090_v9, %s3324_s2  ;;  %v2091_v10 = vadd.f32 %v2090_v9, %v1989_v54  ;;  %v2092_v26 = vmax.f32 %v1990_v55, %v2090_v9  ;;  %v2305_v54 = vld [vmem:[%s3880_s10 + $0x28] sm:$0xff] }
0x2941   :  { %v3025_v55 = vpack.c.bf16 %v2305_v54, %v2304_v53 }
0x29b2   :  { %v2096_v11 = vpop.permute.xlu1 %2095 }
0x29b3   :  { %2838 = vmatmul.mubr.msk.f32.vlgmr.msra.gmra.mrb[28].mxu0 %vm291_vm2, %v2096_v11 }
0x29b4   :  { %2875 = vmatprep.mubr.msk.f32.mxu0 %vm3321_vm0, %v3322_v2  ;;  %3020 = vmatpush3.bf16.msra.mxu0 %v3019_v31 }
0x29b5   :  { %3021 = vmatprep.subr.bf16.mxu0 %v3320_v1 }
0x29b8   :  { %3023 = vmatpush3.bf16.msra.mxu0 %v3022_v23 }
0x29b9   :  { %3024 = vmatprep.subr.bf16.mxu0 %v3320_v1 }
0x29bc   :  { %3026 = vmatpush3.bf16.msra.mxu0 %v3025_v55 }
0x29bd   :  { %3027 = vmatprep.subr.bf16.mxu0 %v3320_v1 }
0x29c0   :  { %3029 = vmatpush3.bf16.msra.mxu0 %v3028_v58 }
0x2a86   :  { %v2165_v12 = vpop.f32.mrb[28].mxu0 }
0x2a87   :  { %v2166_v13 = vadd.f32 %v2165_v12, %v3735_v60  ;;  %v2839_v14 = vpop.f32.mrb[29].mxu0  ;;  %v2205_v60 = vld [vmem:[#allocation13] sm:$0xff] }
0x2a88   :  { %v3007_v29 = vpack.c.bf16 %v2206_v27, %v2205_v60 }
0x2a89   :  { %3164 = vtanh.f32 %v2166_v13  ;;  %v2453_v16 = vmul.f32 -1.442695, %v2166_v13 }
0x2a8a   :  { %3008 = vmatpush3.bf16.msra.mxu1 %v3007_v29 }
0x2a8b   :  { %3166 = vpow2.f32 %v2453_v16  ;;  %3009 = vmatprep.subr.bf16.mxu1 %v3320_v1 }
0x2a8e   :  { %3011 = vmatpush3.bf16.msra.mxu1 %v3010_v33 }
0x2a8f   :  { %3012 = vmatprep.subr.bf16.mxu1 %v3320_v1 }
0x2a92   :  { %3014 = vmatpush3.bf16.msra.mxu1 %v3013_v36 }
0x2a93   :  { %v3165_v15 = vpop.eup %3164  ;;  %3015 = vmatprep.subr.bf16.mxu1 %v3320_v1 }
0x2a94   :  { %2178 = vrot.lane.b32.xlu0 %v3165_v15, %s3323_s23 }
0x2a95   :  { %v3167_v17 = vpop.eup %3166 }
0x2a96   :  { %v2172_v18 = vadd.f32 1.0, %v3167_v17  ;;  %3017 = vmatpush3.bf16.msra.mxu1 %v3016_v39 }
0x2a98   :  { %3168 = vrcp.f32 %v2172_v18 }
0x2aa2   :  { %v3169_v30 = vpop.eup %3168 }
0x2aa3   :  { %v2176_v22 = vmul.f32 %v3169_v30, %v2084_v7 }
0x2b06   :  { %v2179_v20 = vpop.permute.xlu0 %2178 }
0x2b07   :  { %v2181_v21 = vmul.f32 %v3169_v30, %v2179_v20 }
0x2b09   :  { %2183 = vrot.lane.b32.xlu1 %v2181_v21, %s3323_s23 }
0x2b7b   :  { %v2184_v2 = vpop.permute.xlu1 %2183 }
0x2b7c   :  { %v2186_v24 = vadd.f32 %v2184_v2, %v2176_v22 }
0x2b7e   :  { %3170 = vtanh.f32 %v2186_v24 }
0x2b88   :  { %v3171_v35 = vpop.eup %3170 }
0x2b89   :  { %2189 = vrot.lane.b32.xlu0 %v3171_v35, %s3323_s23 }
0x2bfb   :  { %v2190_v41 = vpop.permute.xlu0 %2189 }
0x2bfc   :  { %v2192_v42 = vmul.f32 %v3169_v30, %v2190_v41 }
0x2bfe   :  { %v2193_v43 = vadd.f32 %v2192_v42, %v2091_v10  ;;  %v2194_v47 = vmax.f32 %v2092_v26, %v2192_v42 }
0x2c00   :  { %v2195_v40 = vmul.f32 0.125, %v2193_v43  ;;  %2197 = vrot.lane.b32.xlu1 %v2194_v47, %s3324_s2 }
0x2c02   :  { %2201 = vrot.lane.b32.xlu0 %v2195_v40, %s3325_s6 }
0x2c72   :  { %v2198_v48 = vpop.permute.xlu1 %2197 }
0x2c74   :  { %v2202_v49 = vpop.permute.xlu0 %2201 }
0x2c75   :  { %v2204_v50 = vsel %vm291_vm2, %v2198_v48, %v2202_v49 }
0x2c76   :  { %2857 = vmatmul.mubr.msk.f32.vlgmr.msra.gmra.mrb[26].mxu1 %vm148_vm1, %v2204_v50 }
0x2d49   :  { %v2289_v61 = vpop.f32.mrb[26].mxu1 }
0x2d4a   :  { %v2290_v45 = vadd.f32 %v2454_v59, %v2289_v61  ;;  %v2858_v63 = vpop.f32.mrb[27].mxu1 }
0x2d4c   :  { %v2293_v44 = vmax.f32 %v2290_v45, 0.0 }
0x2d4e   :  { %2296 = vrot.lane.b32.xlu1 %v2293_v44, %s3324_s2  ;;  %v2294_v0 = vadd.f32 %v2293_v44, %v2204_v50 }
0x2dc0   :  { %v2297_v3 = vpop.permute.xlu1 %2296 }
0x2dc1   :  { %v2299_v4 = vadd.f32 %v2297_v3, %v2294_v0 }
0x2dc3   :  { %2876 = vmatmul.mubr.msk.f32.vlgmr.msra.gmra.mrb[30].mxu0 %vm148_vm1, %v2299_v4 }
0x2e96   :  { %v2384_v6 = vpop.f32.mrb[30].mxu0 }
0x2e97   :  { %v2385_v1 = vadd.f32 %v2456_v5, %v2384_v6  ;;  %v2877_v7 = vpop.f32.mrb[31].mxu0 }
0x2e99   :  { %2389 = vst.msk [vmem:[%s3882_s12] sm:$0xff] %vm2388_vm3, %v2385_v1 }
0x2e9a   :  { %2394 = vsyncpa [#allocation6], 1 }
0x2e9b   :  { %2395 = vsyncpa [#allocation8], 1 }
0x2e9c   :  { %2396 = vsyncpa [#allocation11], 1 }
0x2e9d   :  { %2397 = vsyncpa [#allocation14], 1 }

</bundles_post_ra>
